<compile_context>
chip_gen: v6e
topology: v6e:2x2x1
jax: 0.10.0
libtpu: 0.0.40
codegen_flags: <defaults>
</compile_context>

<pallas_src>
import functools

import jax
import jax.numpy as jnp
from jax.experimental import pallas as pl
from jax.experimental.pallas import tpu as pltpu

LANES = 128


def _vmem():
    return pl.BlockSpec(memory_space=pltpu.MemorySpace.VMEM)


# --------------------- fused pre-sort kernel (GCN x2 + proj) ---------------------
def presort_kernel(a_ref, x_ref, w0_ref, b0_ref, w1_ref, b1_ref, wp_ref, bp_ref,
                   slab_ref):
    a = a_ref[...]
    # GCN layer 0:  relu(A_hat @ (X @ W0) + b0)
    xw = jnp.dot(x_ref[...], w0_ref[...], preferred_element_type=jnp.float32)
    h = jnp.maximum(
        jnp.dot(a, xw, preferred_element_type=jnp.float32) + b0_ref[...], 0.0)
    # GCN layer 1 (no relu):  A_hat @ (h @ W1) + b1
    hw = jnp.dot(h, w1_ref[...], preferred_element_type=jnp.float32)
    h1 = jnp.dot(a, hw, preferred_element_type=jnp.float32) + b1_ref[...]

    n, c = h1.shape
    lanes = slab_ref.shape[1]

    # Score, already lane-dense: wp is replicated to (C, 128) on the host, so
    # the MXU emits g broadcast across all lanes -- no (N,1) result and no
    # cross-lane broadcast afterwards.
    g_b = jnp.dot(h1, wp_ref[...], preferred_element_type=jnp.float32) + bp_ref[...]

    # One-hot placement matrices; the MXU has huge slack at these shapes.
    lane = jax.lax.broadcasted_iota(jnp.int32, (c, lanes), 1)
    row = jax.lax.broadcasted_iota(jnp.int32, (c, lanes), 0)
    p_h1 = (lane == row).astype(jnp.float32)        # h1   -> lanes [0, C)
    p_gh = (lane == row + c).astype(jnp.float32)    # g*h1 -> lanes [C, 2C)
    p_g = (jax.lax.broadcasted_iota(jnp.int32, (1, lanes), 1) == 2 * c
           ).astype(jnp.float32)                    # g    -> lane 2C

    slab = (jnp.dot(h1, p_h1, preferred_element_type=jnp.float32)
            + g_b * (jnp.dot(h1, p_gh, preferred_element_type=jnp.float32) + p_g))
    slab_ref[...] = slab.astype(slab_ref.dtype)     # single unmasked full store


def gcn_proj_fused(a_hat, x, w0, b0, w1, b1, wp, bp):
    n, f = x.shape
    hdim = w0.shape[1]
    c = w1.shape[1]
    assert 2 * c + 1 <= LANES, "num_cls too large for the 128-lane slab"
    wp_rep = jnp.tile(wp, (1, LANES))                 # (C, 128) replicated proj
    bp_rep = jnp.tile(bp.reshape(1, 1), (1, LANES))   # (1, 128)

    flops = 2 * (n * f * hdim + n * n * hdim + n * hdim * c + n * n * c
                 + 3 * n * c * LANES)
    bytes_accessed = 4 * (n * n + n * f + f * hdim + hdim + hdim * c + c
                          + 2 * c * LANES + n * LANES)
    return pl.pallas_call(
        presort_kernel,
        out_shape=jax.ShapeDtypeStruct((n, LANES), jnp.float32),
        in_specs=[_vmem()] * 8,
        out_specs=_vmem(),
        cost_estimate=pl.CostEstimate(flops=flops, transcendentals=0,
                                      bytes_accessed=bytes_accessed),
    )(a_hat, x, w0, b0.reshape(1, -1), w1, b1.reshape(1, -1), wp_rep, bp_rep)
    # TODO(synk): for large N, row-tile a_hat with a ("parallel", ...) grid and
    # derive the tile from pltpu.CompilerParams(vmem_limit_bytes=...) (v7x has
    # only 64 MiB VMEM and 2 TCs); grid=() is right at these toy shapes.


# ---------------- fused post-sort kernel (conv1d -> conv1d_2 -> lin) -------------
def postsort_kernel(slab_ref, wc1_ref, bc1_ref, wc2_ref, bc2_ref,
                    wlt_ref, wlb_ref, bl_ref, o_ref, pad_buf, *, K, C):
    N = slab_ref.shape[0]
    pad = (K - 1) // 2
    OFF = 8                                   # sublane-aligned live-row offset
    TAIL = pad_buf.shape[0] - OFF - N

    h1_sorted = slab_ref[:, :C]               # h1[order]
    x_scaled = slab_ref[:, C:2 * C]           # (g * h1)[order]

    # Zero only the halo rows; live rows [OFF, OFF+N) are overwritten below and
    # the boundary rows stay zero for both convolutions ("same" padding).
    pad_buf[pl.ds(0, OFF), :] = jnp.zeros((OFF, C), pad_buf.dtype)
    pad_buf[pl.ds(OFF + N, TAIL), :] = jnp.zeros((TAIL, C), pad_buf.dtype)

    def conv_same(x_val, w_ref, b_ref, relu):
        # "same" Conv1d along the node axis:
        #   out[n, co] = b[co] + sum_k sum_ci xpad[n+k, ci] * W[k, ci, co]
        pad_buf[pl.ds(OFF, N), :] = x_val
        y = b_ref[...]
        for k in range(K):                    # K small (N,C)@(C,C) MXU matmuls
            xk = pad_buf[pl.ds(OFF - pad + k, N), :]
            y = y + jnp.dot(xk, w_ref[k], preferred_element_type=jnp.float32)
        return jnp.maximum(y, 0.0) if relu else y

    s1 = conv_same(x_scaled, wc1_ref, bc1_ref, relu=True)    # conv1d + relu
    s2 = conv_same(s1, wc2_ref, bc2_ref, relu=False)         # conv1d_2

    # Final Linear(2C, C) without materializing the concat:
    #   cat([h1, h2]) @ wl == h1 @ wl_top + h2 @ wl_bot.
    # Weights are lane-padded to 128 so this is one unmasked (N,128) store.
    out = (jnp.dot(h1_sorted, wlt_ref[...], preferred_element_type=jnp.float32)
           + jnp.dot(s2, wlb_ref[...], preferred_element_type=jnp.float32)
           + bl_ref[...])
    o_ref[...] = out.astype(o_ref.dtype)


def conv_lin_fused(slab_sorted, w_c1, b_c1, w_c2, b_c2, wl, bl):
    n, lanes = slab_sorted.shape
    k, _, c = w_c1.shape
    pad = (k - 1) // 2
    assert pad <= 8, "kernel size too large for the fixed 8-row halo"

    # lane-pad the final-linear weights/bias to 128 output lanes (zeros beyond C)
    wl_top = jnp.zeros((c, lanes), wl.dtype).at[:, :c].set(wl[:c])
    wl_bot = jnp.zeros((c, lanes), wl.dtype).at[:, :c].set(wl[c:])
    bl_pad = jnp.zeros((1, lanes), bl.dtype).at[0, :c].set(bl)

    flops = 2 * n * (2 * k * c * c + 2 * c * lanes)
    bytes_accessed = 4 * (2 * n * lanes + 2 * k * c * c + 2 * c * lanes
                          + lanes + 2 * c)
    return pl.pallas_call(
        functools.partial(postsort_kernel, K=k, C=c),
        out_shape=jax.ShapeDtypeStruct((n, lanes), jnp.float32),
        in_specs=[_vmem()] * 8,
        out_specs=_vmem(),
        scratch_shapes=[pltpu.VMEM((8 + n + 8, c), jnp.float32)],
        cost_estimate=pl.CostEstimate(flops=flops, transcendentals=0,
                                      bytes_accessed=bytes_accessed),
    )(slab_sorted, w_c1, b_c1.reshape(1, -1), w_c2, b_c2.reshape(1, -1),
      wl_top, wl_bot, bl_pad)


# ------------------------------ NLGNN forward ------------------------------------
def nlgnn_forward(params, x, a_hat):
    c = params["w1"].shape[1]
    n = x.shape[0]
    slab = gcn_proj_fused(a_hat, x,
                          params["w0"], params["b0"],
                          params["w1"], params["b1"],
                          params["wp"], params["bp"])

    # TODO(synk): torch.sort and the permutation gather have no clean Pallas
    #             TPU equivalent at this size; argsort + one gather stay as XLA
    #             glue (jnp.argsort is stable, torch.sort is not -- tie-breaks
    #             on equal scores may differ from the PyTorch reference).
    order = jnp.argsort(slab[:, 2 * c])          # ascending, matches torch.sort
    slab_sorted = slab[order]                    # one gather of [h1 | g*h1 | g]

    out_sorted = conv_lin_fused(slab_sorted,
                                params["w_c1"], params["b_c1"],
                                params["w_c2"], params["b_c2"],
                                params["wl"], params["bl"])[:, :c]
    # Scatter back in place of a second argsort + gather (order is a permutation).
    return jnp.zeros((n, c), out_sorted.dtype).at[order].set(
        out_sorted, unique_indices=True)


# ------------------------------ main ----------------------------------------------
if __name__ == "__main__":
    # config: n_gnn_layers=2, num_feats=16, gnn_hid_dim=32, num_cls=8, kernel=5
    N, F, H, C, K = 128, 16, 32, 8, 5
    E = 512

    key = jax.random.PRNGKey(0)
    keys = jax.random.split(key, 12)

    # node features
    x = jax.random.normal(keys[0], (N, F), jnp.float32)

    # random edge_index -> dense symmetric normalized adjacency (GCNConv propagation)
    src = jax.random.randint(keys[1], (E,), 0, N)
    dst = jax.random.randint(keys[2], (E,), 0, N)
    A = jnp.zeros((N, N), jnp.float32).at[src, dst].set(1.0)
    A = jnp.maximum(A, A.T)                                   # symmetrize
    A = A.at[jnp.arange(N), jnp.arange(N)].set(1.0)           # self loops
    deg_inv_sqrt = 1.0 / jnp.sqrt(A.sum(axis=1))
    a_hat = A * deg_inv_sqrt[:, None] * deg_inv_sqrt[None, :]

    def init(k, shape, scale=0.1):
        return scale * jax.random.normal(k, shape, jnp.float32)

    params = {
        # GCNConv 0: in=F, out=H ; GCNConv 1: in=H, out=C
        "w0": init(keys[3], (F, H)),   "b0": jnp.zeros((H,), jnp.float32),
        "w1": init(keys[4], (H, C)),   "b1": jnp.zeros((C,), jnp.float32),
        # proj: Linear(C, 1)
        "wp": init(keys[5], (C, 1)),   "bp": jnp.zeros((1,), jnp.float32),
        # conv1d / conv1d_2: weights stored as (K, Cin, Cout); importing real
        # torch Conv1d weights (Cout, Cin, K) requires .permute(2, 1, 0).
        "w_c1": init(keys[6], (K, C, C)), "b_c1": init(keys[7], (C,)),
        "w_c2": init(keys[8], (K, C, C)), "b_c2": init(keys[9], (C,)),
        # lin: Linear(2C, C)
        "wl": init(keys[10], (2 * C, C)), "bl": jnp.zeros((C,), jnp.float32),
    }

    out = jax.jit(nlgnn_forward)(params, x, a_hat)
    jax.block_until_ready(out)
    assert out.shape == (N, C) and out.dtype == jnp.float32
    print("KERNEL_OK")
</pallas_src>

<mosaic_0001>
module attributes {stable_mosaic.version = 11 : i64} {
  func.func @presort_kernel(%arg0: memref<128x128xf32, #tpu.memory_space<vmem>>, %arg1: memref<128x16xf32, #tpu.memory_space<vmem>>, %arg2: memref<16x32xf32, #tpu.memory_space<vmem>>, %arg3: memref<1x32xf32, #tpu.memory_space<vmem>>, %arg4: memref<32x8xf32, #tpu.memory_space<vmem>>, %arg5: memref<1x8xf32, #tpu.memory_space<vmem>>, %arg6: memref<8x128xf32, #tpu.memory_space<vmem>>, %arg7: memref<1x128xf32, #tpu.memory_space<vmem>>, %arg8: memref<128x128xf32, #tpu.memory_space<vmem>>) attributes {dimension_semantics = [], scalar_prefetch = 0 : i64, scratch_operands = 0 : i64, tpu.core_type = #tpu.core_type<tc>} {
    %c0 = arith.constant 0 : index
    %c0_0 = arith.constant 0 : index
    %0 = vector.load %arg0[%c0, %c0_0] : memref<128x128xf32, #tpu.memory_space<vmem>>, vector<128x128xf32>
    %c0_1 = arith.constant 0 : index
    %c0_2 = arith.constant 0 : index
    %1 = vector.load %arg1[%c0_1, %c0_2] : memref<128x16xf32, #tpu.memory_space<vmem>>, vector<128x16xf32>
    %c0_3 = arith.constant 0 : index
    %c0_4 = arith.constant 0 : index
    %2 = vector.load %arg2[%c0_3, %c0_4] : memref<16x32xf32, #tpu.memory_space<vmem>>, vector<16x32xf32>
    %cst = arith.constant dense<0.000000e+00> : vector<128x32xf32>
    %3 = tpu.matmul %1, %2, %cst {dimension_numbers = #tpu.dot_dimension_numbers<[1], [0], [0], [1], [0, 0, 1, 1], [], []>} : vector<128x16xf32>, vector<16x32xf32>, vector<128x32xf32> -> vector<128x32xf32>
    %cst_5 = arith.constant dense<0.000000e+00> : vector<128x32xf32>
    %4 = tpu.matmul %0, %3, %cst_5 {dimension_numbers = #tpu.dot_dimension_numbers<[1], [0], [0], [1], [0, 0, 1, 1], [], []>} : vector<128x128xf32>, vector<128x32xf32>, vector<128x32xf32> -> vector<128x32xf32>
    %c0_6 = arith.constant 0 : index
    %c0_7 = arith.constant 0 : index
    %5 = vector.load %arg3[%c0_6, %c0_7] : memref<1x32xf32, #tpu.memory_space<vmem>>, vector<1x32xf32>
    %6 = vector.broadcast %5 : vector<1x32xf32> to vector<128x32xf32>
    %7 = arith.addf %4, %6 : vector<128x32xf32>
    %cst_8 = arith.constant 0.000000e+00 : f32
    %8 = vector.broadcast %cst_8 : f32 to vector<128x32xf32>
    %9 = arith.maximumf %7, %8 : vector<128x32xf32>
    %c0_9 = arith.constant 0 : index
    %c0_10 = arith.constant 0 : index
    %10 = vector.load %arg4[%c0_9, %c0_10] : memref<32x8xf32, #tpu.memory_space<vmem>>, vector<32x8xf32>
    %cst_11 = arith.constant dense<0.000000e+00> : vector<128x8xf32>
    %11 = tpu.matmul %9, %10, %cst_11 {dimension_numbers = #tpu.dot_dimension_numbers<[1], [0], [0], [1], [0, 0, 1, 1], [], []>} : vector<128x32xf32>, vector<32x8xf32>, vector<128x8xf32> -> vector<128x8xf32>
    %cst_12 = arith.constant dense<0.000000e+00> : vector<128x8xf32>
    %12 = tpu.matmul %0, %11, %cst_12 {dimension_numbers = #tpu.dot_dimension_numbers<[1], [0], [0], [1], [0, 0, 1, 1], [], []>} : vector<128x128xf32>, vector<128x8xf32>, vector<128x8xf32> -> vector<128x8xf32>
    %c0_13 = arith.constant 0 : index
    %c0_14 = arith.constant 0 : index
    %13 = vector.load %arg5[%c0_13, %c0_14] : memref<1x8xf32, #tpu.memory_space<vmem>>, vector<1x8xf32>
    %14 = vector.broadcast %13 : vector<1x8xf32> to vector<128x8xf32>
    %15 = arith.addf %12, %14 : vector<128x8xf32>
    %c0_15 = arith.constant 0 : index
    %c0_16 = arith.constant 0 : index
    %16 = vector.load %arg6[%c0_15, %c0_16] : memref<8x128xf32, #tpu.memory_space<vmem>>, vector<8x128xf32>
    %cst_17 = arith.constant dense<0.000000e+00> : vector<128x128xf32>
    %17 = tpu.matmul %15, %16, %cst_17 {dimension_numbers = #tpu.dot_dimension_numbers<[1], [0], [0], [1], [0, 0, 1, 1], [], []>} : vector<128x8xf32>, vector<8x128xf32>, vector<128x128xf32> -> vector<128x128xf32>
    %c0_18 = arith.constant 0 : index
    %c0_19 = arith.constant 0 : index
    %18 = vector.load %arg7[%c0_18, %c0_19] : memref<1x128xf32, #tpu.memory_space<vmem>>, vector<1x128xf32>
    %19 = vector.broadcast %18 : vector<1x128xf32> to vector<128x128xf32>
    %20 = arith.addf %17, %19 : vector<128x128xf32>
    %21 = tpu.iota {dimensions = array<i32: 1>} : vector<8x128xi32>
    %22 = tpu.iota {dimensions = array<i32: 0>} : vector<8x128xi32>
    %23 = arith.cmpi eq, %21, %22 : vector<8x128xi32>
    %24 = arith.extui %23 : vector<8x128xi1> to vector<8x128xi32>
    %25 = arith.sitofp %24 : vector<8x128xi32> to vector<8x128xf32>
    %c8_i32 = arith.constant 8 : i32
    %26 = vector.broadcast %c8_i32 : i32 to vector<8x128xi32>
    %27 = arith.addi %22, %26 : vector<8x128xi32>
    %28 = arith.cmpi eq, %21, %27 : vector<8x128xi32>
    %29 = arith.extui %28 : vector<8x128xi1> to vector<8x128xi32>
    %30 = arith.sitofp %29 : vector<8x128xi32> to vector<8x128xf32>
    %31 = tpu.iota {dimensions = array<i32: 1>} : vector<1x128xi32>
    %c16_i32 = arith.constant 16 : i32
    %32 = vector.broadcast %c16_i32 : i32 to vector<1x128xi32>
    %33 = arith.cmpi eq, %31, %32 : vector<1x128xi32>
    %34 = arith.extui %33 : vector<1x128xi1> to vector<1x128xi32>
    %35 = arith.sitofp %34 : vector<1x128xi32> to vector<1x128xf32>
    %cst_20 = arith.constant dense<0.000000e+00> : vector<128x128xf32>
    %36 = tpu.matmul %15, %25, %cst_20 {dimension_numbers = #tpu.dot_dimension_numbers<[1], [0], [0], [1], [0, 0, 1, 1], [], []>} : vector<128x8xf32>, vector<8x128xf32>, vector<128x128xf32> -> vector<128x128xf32>
    %cst_21 = arith.constant dense<0.000000e+00> : vector<128x128xf32>
    %37 = tpu.matmul %15, %30, %cst_21 {dimension_numbers = #tpu.dot_dimension_numbers<[1], [0], [0], [1], [0, 0, 1, 1], [], []>} : vector<128x8xf32>, vector<8x128xf32>, vector<128x128xf32> -> vector<128x128xf32>
    %38 = vector.broadcast %35 : vector<1x128xf32> to vector<128x128xf32>
    %39 = arith.addf %37, %38 : vector<128x128xf32>
    %40 = arith.mulf %20, %39 : vector<128x128xf32>
    %41 = arith.addf %36, %40 : vector<128x128xf32>
    %c0_22 = arith.constant 0 : index
    %c0_23 = arith.constant 0 : index
    %42 = vector.load %arg8[%c0_22, %c0_23] : memref<128x128xf32, #tpu.memory_space<vmem>>, vector<128x128xf32>
    tpu.vector_store %arg8[%c0_22, %c0_23], %41 {strides = array<i32>} : memref<128x128xf32, #tpu.memory_space<vmem>>, vector<128x128xf32>,
    return
  }
}

module attributes {stable_mosaic.version = 11 : i64} {
  func.func @postsort_kernel(%arg0: memref<128x128xf32, #tpu.memory_space<vmem>>, %arg1: memref<5x8x8xf32, #tpu.memory_space<vmem>>, %arg2: memref<1x8xf32, #tpu.memory_space<vmem>>, %arg3: memref<5x8x8xf32, #tpu.memory_space<vmem>>, %arg4: memref<1x8xf32, #tpu.memory_space<vmem>>, %arg5: memref<8x128xf32, #tpu.memory_space<vmem>>, %arg6: memref<8x128xf32, #tpu.memory_space<vmem>>, %arg7: memref<1x128xf32, #tpu.memory_space<vmem>>, %arg8: memref<128x128xf32, #tpu.memory_space<vmem>>, %arg9: memref<144x8xf32, #tpu.memory_space<vmem>>) attributes {dimension_semantics = [], scalar_prefetch = 0 : i64, scratch_operands = 1 : i64, tpu.core_type = #tpu.core_type<tc>} {
    %c0 = arith.constant 0 : index
    %c0_0 = arith.constant 0 : index
    %0 = vector.load %arg0[%c0, %c0_0] : memref<128x128xf32, #tpu.memory_space<vmem>>, vector<128x8xf32>
    %c0_1 = arith.constant 0 : index
    %c8 = arith.constant 8 : index
    %1 = vector.load %arg0[%c0_1, %c8] : memref<128x128xf32, #tpu.memory_space<vmem>>, vector<128x8xf32>
    %cst = arith.constant 0.000000e+00 : f32
    %2 = vector.broadcast %cst : f32 to vector<8x8xf32>
    %c0_2 = arith.constant 0 : index
    %c0_3 = arith.constant 0 : index
    %3 = vector.load %arg9[%c0_2, %c0_3] : memref<144x8xf32, #tpu.memory_space<vmem>>, vector<8x8xf32>
    tpu.vector_store %arg9[%c0_2, %c0_3], %2 {strides = array<i32>} : memref<144x8xf32, #tpu.memory_space<vmem>>, vector<8x8xf32>,
    %cst_4 = arith.constant 0.000000e+00 : f32
    %4 = vector.broadcast %cst_4 : f32 to vector<8x8xf32>
    %c136 = arith.constant 136 : index
    %c0_5 = arith.constant 0 : index
    %5 = vector.load %arg9[%c136, %c0_5] : memref<144x8xf32, #tpu.memory_space<vmem>>, vector<8x8xf32>
    tpu.vector_store %arg9[%c136, %c0_5], %4 {strides = array<i32>} : memref<144x8xf32, #tpu.memory_space<vmem>>, vector<8x8xf32>,
    %c8_6 = arith.constant 8 : index
    %c0_7 = arith.constant 0 : index
    %6 = vector.load %arg9[%c8_6, %c0_7] : memref<144x8xf32, #tpu.memory_space<vmem>>, vector<128x8xf32>
    tpu.vector_store %arg9[%c8_6, %c0_7], %1 {strides = array<i32>} : memref<144x8xf32, #tpu.memory_space<vmem>>, vector<128x8xf32>,
    %c0_8 = arith.constant 0 : index
    %c0_9 = arith.constant 0 : index
    %7 = vector.load %arg2[%c0_8, %c0_9] : memref<1x8xf32, #tpu.memory_space<vmem>>, vector<1x8xf32>
    %c6 = arith.constant 6 : index
    %c0_10 = arith.constant 0 : index
    %8 = vector.load %arg9[%c6, %c0_10] : memref<144x8xf32, #tpu.memory_space<vmem>>, vector<128x8xf32>
    %c0_11 = arith.constant 0 : index
    %c0_12 = arith.constant 0 : index
    %c0_13 = arith.constant 0 : index
    %9 = vector.load %arg1[%c0_11, %c0_12, %c0_13] : memref<5x8x8xf32, #tpu.memory_space<vmem>>, vector<1x8x8xf32>
    %10 = vector.shape_cast %9 : vector<1x8x8xf32> to vector<8x8xf32>
    %cst_14 = arith.constant dense<0.000000e+00> : vector<128x8xf32>
    %11 = tpu.matmul %8, %10, %cst_14 {dimension_numbers = #tpu.dot_dimension_numbers<[1], [0], [0], [1], [0, 0, 1, 1], [], []>} : vector<128x8xf32>, vector<8x8xf32>, vector<128x8xf32> -> vector<128x8xf32>
    %12 = vector.broadcast %7 : vector<1x8xf32> to vector<128x8xf32>
    %13 = arith.addf %12, %11 : vector<128x8xf32>
    %c7 = arith.constant 7 : index
    %c0_15 = arith.constant 0 : index
    %14 = vector.load %arg9[%c7, %c0_15] : memref<144x8xf32, #tpu.memory_space<vmem>>, vector<128x8xf32>
    %c1 = arith.constant 1 : index
    %c0_16 = arith.constant 0 : index
    %c0_17 = arith.constant 0 : index
    %15 = vector.load %arg1[%c1, %c0_16, %c0_17] : memref<5x8x8xf32, #tpu.memory_space<vmem>>, vector<1x8x8xf32>
    %16 = vector.shape_cast %15 : vector<1x8x8xf32> to vector<8x8xf32>
    %cst_18 = arith.constant dense<0.000000e+00> : vector<128x8xf32>
    %17 = tpu.matmul %14, %16, %cst_18 {dimension_numbers = #tpu.dot_dimension_numbers<[1], [0], [0], [1], [0, 0, 1, 1], [], []>} : vector<128x8xf32>, vector<8x8xf32>, vector<128x8xf32> -> vector<128x8xf32>
    %18 = arith.addf %13, %17 : vector<128x8xf32>
    %c8_19 = arith.constant 8 : index
    %c0_20 = arith.constant 0 : index
    %19 = vector.load %arg9[%c8_19, %c0_20] : memref<144x8xf32, #tpu.memory_space<vmem>>, vector<128x8xf32>
    %c2 = arith.constant 2 : index
    %c0_21 = arith.constant 0 : index
    %c0_22 = arith.constant 0 : index
    %20 = vector.load %arg1[%c2, %c0_21, %c0_22] : memref<5x8x8xf32, #tpu.memory_space<vmem>>, vector<1x8x8xf32>
    %21 = vector.shape_cast %20 : vector<1x8x8xf32> to vector<8x8xf32>
    %cst_23 = arith.constant dense<0.000000e+00> : vector<128x8xf32>
    %22 = tpu.matmul %19, %21, %cst_23 {dimension_numbers = #tpu.dot_dimension_numbers<[1], [0], [0], [1], [0, 0, 1, 1], [], []>} : vector<128x8xf32>, vector<8x8xf32>, vector<128x8xf32> -> vector<128x8xf32>
    %23 = arith.addf %18, %22 : vector<128x8xf32>
    %c9 = arith.constant 9 : index
    %c0_24 = arith.constant 0 : index
    %24 = vector.load %arg9[%c9, %c0_24] : memref<144x8xf32, #tpu.memory_space<vmem>>, vector<128x8xf32>
    %c3 = arith.constant 3 : index
    %c0_25 = arith.constant 0 : index
    %c0_26 = arith.constant 0 : index
    %25 = vector.load %arg1[%c3, %c0_25, %c0_26] : memref<5x8x8xf32, #tpu.memory_space<vmem>>, vector<1x8x8xf32>
    %26 = vector.shape_cast %25 : vector<1x8x8xf32> to vector<8x8xf32>
    %cst_27 = arith.constant dense<0.000000e+00> : vector<128x8xf32>
    %27 = tpu.matmul %24, %26, %cst_27 {dimension_numbers = #tpu.dot_dimension_numbers<[1], [0], [0], [1], [0, 0, 1, 1], [], []>} : vector<128x8xf32>, vector<8x8xf32>, vector<128x8xf32> -> vector<128x8xf32>
    %28 = arith.addf %23, %27 : vector<128x8xf32>
    %c10 = arith.constant 10 : index
    %c0_28 = arith.constant 0 : index
    %29 = vector.load %arg9[%c10, %c0_28] : memref<144x8xf32, #tpu.memory_space<vmem>>, vector<128x8xf32>
    %c4 = arith.constant 4 : index
    %c0_29 = arith.constant 0 : index
    %c0_30 = arith.constant 0 : index
    %30 = vector.load %arg1[%c4, %c0_29, %c0_30] : memref<5x8x8xf32, #tpu.memory_space<vmem>>, vector<1x8x8xf32>
    %31 = vector.shape_cast %30 : vector<1x8x8xf32> to vector<8x8xf32>
    %cst_31 = arith.constant dense<0.000000e+00> : vector<128x8xf32>
    %32 = tpu.matmul %29, %31, %cst_31 {dimension_numbers = #tpu.dot_dimension_numbers<[1], [0], [0], [1], [0, 0, 1, 1], [], []>} : vector<128x8xf32>, vector<8x8xf32>, vector<128x8xf32> -> vector<128x8xf32>
    %33 = arith.addf %28, %32 : vector<128x8xf32>
    %cst_32 = arith.constant 0.000000e+00 : f32
    %34 = vector.broadcast %cst_32 : f32 to vector<128x8xf32>
    %35 = arith.maximumf %33, %34 : vector<128x8xf32>
    %c8_33 = arith.constant 8 : index
    %c0_34 = arith.constant 0 : index
    %36 = vector.load %arg9[%c8_33, %c0_34] : memref<144x8xf32, #tpu.memory_space<vmem>>, vector<128x8xf32>
    tpu.vector_store %arg9[%c8_33, %c0_34], %35 {strides = array<i32>} : memref<144x8xf32, #tpu.memory_space<vmem>>, vector<128x8xf32>,
    %c0_35 = arith.constant 0 : index
    %c0_36 = arith.constant 0 : index
    %37 = vector.load %arg4[%c0_35, %c0_36] : memref<1x8xf32, #tpu.memory_space<vmem>>, vector<1x8xf32>
    %c6_37 = arith.constant 6 : index
    %c0_38 = arith.constant 0 : index
    %38 = vector.load %arg9[%c6_37, %c0_38] : memref<144x8xf32, #tpu.memory_space<vmem>>, vector<128x8xf32>
    %c0_39 = arith.constant 0 : index
    %c0_40 = arith.constant 0 : index
    %c0_41 = arith.constant 0 : index
    %39 = vector.load %arg3[%c0_39, %c0_40, %c0_41] : memref<5x8x8xf32, #tpu.memory_space<vmem>>, vector<1x8x8xf32>
    %40 = vector.shape_cast %39 : vector<1x8x8xf32> to vector<8x8xf32>
    %cst_42 = arith.constant dense<0.000000e+00> : vector<128x8xf32>
    %41 = tpu.matmul %38, %40, %cst_42 {dimension_numbers = #tpu.dot_dimension_numbers<[1], [0], [0], [1], [0, 0, 1, 1], [], []>} : vector<128x8xf32>, vector<8x8xf32>, vector<128x8xf32> -> vector<128x8xf32>
    %42 = vector.broadcast %37 : vector<1x8xf32> to vector<128x8xf32>
    %43 = arith.addf %42, %41 : vector<128x8xf32>
    %c7_43 = arith.constant 7 : index
    %c0_44 = arith.constant 0 : index
    %44 = vector.load %arg9[%c7_43, %c0_44] : memref<144x8xf32, #tpu.memory_space<vmem>>, vector<128x8xf32>
    %c1_45 = arith.constant 1 : index
    %c0_46 = arith.constant 0 : index
    %c0_47 = arith.constant 0 : index
    %45 = vector.load %arg3[%c1_45, %c0_46, %c0_47] : memref<5x8x8xf32, #tpu.memory_space<vmem>>, vector<1x8x8xf32>
    %46 = vector.shape_cast %45 : vector<1x8x8xf32> to vector<8x8xf32>
    %cst_48 = arith.constant dense<0.000000e+00> : vector<128x8xf32>
    %47 = tpu.matmul %44, %46, %cst_48 {dimension_numbers = #tpu.dot_dimension_numbers<[1], [0], [0], [1], [0, 0, 1, 1], [], []>} : vector<128x8xf32>, vector<8x8xf32>, vector<128x8xf32> -> vector<128x8xf32>
    %48 = arith.addf %43, %47 : vector<128x8xf32>
    %c8_49 = arith.constant 8 : index
    %c0_50 = arith.constant 0 : index
    %49 = vector.load %arg9[%c8_49, %c0_50] : memref<144x8xf32, #tpu.memory_space<vmem>>, vector<128x8xf32>
    %c2_51 = arith.constant 2 : index
    %c0_52 = arith.constant 0 : index
    %c0_53 = arith.constant 0 : index
    %50 = vector.load %arg3[%c2_51, %c0_52, %c0_53] : memref<5x8x8xf32, #tpu.memory_space<vmem>>, vector<1x8x8xf32>
    %51 = vector.shape_cast %50 : vector<1x8x8xf32> to vector<8x8xf32>
    %cst_54 = arith.constant dense<0.000000e+00> : vector<128x8xf32>
    %52 = tpu.matmul %49, %51, %cst_54 {dimension_numbers = #tpu.dot_dimension_numbers<[1], [0], [0], [1], [0, 0, 1, 1], [], []>} : vector<128x8xf32>, vector<8x8xf32>, vector<128x8xf32> -> vector<128x8xf32>
    %53 = arith.addf %48, %52 : vector<128x8xf32>
    %c9_55 = arith.constant 9 : index
    %c0_56 = arith.constant 0 : index
    %54 = vector.load %arg9[%c9_55, %c0_56] : memref<144x8xf32, #tpu.memory_space<vmem>>, vector<128x8xf32>
    %c3_57 = arith.constant 3 : index
    %c0_58 = arith.constant 0 : index
    %c0_59 = arith.constant 0 : index
    %55 = vector.load %arg3[%c3_57, %c0_58, %c0_59] : memref<5x8x8xf32, #tpu.memory_space<vmem>>, vector<1x8x8xf32>
    %56 = vector.shape_cast %55 : vector<1x8x8xf32> to vector<8x8xf32>
    %cst_60 = arith.constant dense<0.000000e+00> : vector<128x8xf32>
    %57 = tpu.matmul %54, %56, %cst_60 {dimension_numbers = #tpu.dot_dimension_numbers<[1], [0], [0], [1], [0, 0, 1, 1], [], []>} : vector<128x8xf32>, vector<8x8xf32>, vector<128x8xf32> -> vector<128x8xf32>
    %58 = arith.addf %53, %57 : vector<128x8xf32>
    %c10_61 = arith.constant 10 : index
    %c0_62 = arith.constant 0 : index
    %59 = vector.load %arg9[%c10_61, %c0_62] : memref<144x8xf32, #tpu.memory_space<vmem>>, vector<128x8xf32>
    %c4_63 = arith.constant 4 : index
    %c0_64 = arith.constant 0 : index
    %c0_65 = arith.constant 0 : index
    %60 = vector.load %arg3[%c4_63, %c0_64, %c0_65] : memref<5x8x8xf32, #tpu.memory_space<vmem>>, vector<1x8x8xf32>
    %61 = vector.shape_cast %60 : vector<1x8x8xf32> to vector<8x8xf32>
    %cst_66 = arith.constant dense<0.000000e+00> : vector<128x8xf32>
    %62 = tpu.matmul %59, %61, %cst_66 {dimension_numbers = #tpu.dot_dimension_numbers<[1], [0], [0], [1], [0, 0, 1, 1], [], []>} : vector<128x8xf32>, vector<8x8xf32>, vector<128x8xf32> -> vector<128x8xf32>
    %63 = arith.addf %58, %62 : vector<128x8xf32>
    %c0_67 = arith.constant 0 : index
    %c0_68 = arith.constant 0 : index
    %64 = vector.load %arg5[%c0_67, %c0_68] : memref<8x128xf32, #tpu.memory_space<vmem>>, vector<8x128xf32>
    %cst_69 = arith.constant dense<0.000000e+00> : vector<128x128xf32>
    %65 = tpu.matmul %0, %64, %cst_69 {dimension_numbers = #tpu.dot_dimension_numbers<[1], [0], [0], [1], [0, 0, 1, 1], [], []>} : vector<128x8xf32>, vector<8x128xf32>, vector<128x128xf32> -> vector<128x128xf32>
    %c0_70 = arith.constant 0 : index
    %c0_71 = arith.constant 0 : index
    %66 = vector.load %arg6[%c0_70, %c0_71] : memref<8x128xf32, #tpu.memory_space<vmem>>, vector<8x128xf32>
    %cst_72 = arith.constant dense<0.000000e+00> : vector<128x128xf32>
    %67 = tpu.matmul %63, %66, %cst_72 {dimension_numbers = #tpu.dot_dimension_numbers<[1], [0], [0], [1], [0, 0, 1, 1], [], []>} : vector<128x8xf32>, vector<8x128xf32>, vector<128x128xf32> -> vector<128x128xf32>
    %68 = arith.addf %65, %67 : vector<128x128xf32>
    %c0_73 = arith.constant 0 : index
    %c0_74 = arith.constant 0 : index
    %69 = vector.load %arg7[%c0_73, %c0_74] : memref<1x128xf32, #tpu.memory_space<vmem>>, vector<1x128xf32>
    %70 = vector.broadcast %69 : vector<1x128xf32> to vector<128x128xf32>
    %71 = arith.addf %68, %70 : vector<128x128xf32>
    %c0_75 = arith.constant 0 : index
    %c0_76 = arith.constant 0 : index
    %72 = vector.load %arg8[%c0_75, %c0_76] : memref<128x128xf32, #tpu.memory_space<vmem>>, vector<128x128xf32>
    tpu.vector_store %arg8[%c0_75, %c0_76], %71 {strides = array<i32>} : memref<128x128xf32, #tpu.memory_space<vmem>>, vector<128x128xf32>,
    return
  }
}

</mosaic_0001>

<bundles_post_ra>
// kernel: nlgnn_forward.2
= control target key start
LH: loop header
LB: loop body
LE: loop exit
PB: predicated region body
PF: predicated region fallthrough
CT: control target
= control target key end

     0   :  { %vm63_vm0 = vcmask 130048   ;;  %vm429_vm1 = vcmask 261120   ;;  %vm783_vm4 = vcmask 64512   ;;  %s2248_s2 = inlined_call_operand.vmem [shape: f32[16,32], index: 2, kind: input, shape index: {}]   ;;  %s2249_s1 = inlined_call_operand.vmem [shape: f32[128,16], index: 1, kind: input, shape index: {}]   ;;  %s2250_s0 = inlined_call_operand.vmem [shape: f32[128,128], index: 0, kind: input, shape index: {}]   ;;  %s2251_s4 = inlined_call_operand.vmem [shape: f32[32,8], index: 4, kind: input, shape index: {}]   ;;  %s2252_s3 = inlined_call_operand.vmem [shape: f32[1,32], index: 3, kind: input, shape index: {}]   ;;  %s2253_s6 = inlined_call_operand.vmem [shape: f32[8,128], index: 6, kind: input, shape index: {}]   ;;  %s2254_s5 = inlined_call_operand.vmem [shape: f32[1,8], index: 5, kind: input, shape index: {}]   ;;  %s2255_s7 = inlined_call_operand.vmem [shape: f32[1,128], index: 7, kind: input, shape index: {}]   ;;  %s2256_s8 = inlined_call_operand.vmem [shape: f32[128,128], index: 8, kind: output, shape index: {}]  }
   0x1   :  { %v62_v0 = vld [vmem:[%s2248_s2 + $0x8] sm:$0xff]  ;;  %v61_v1 = vld [vmem:[%s2248_s2] sm:$0xff]  ;;  %v47_v4 = vld [vmem:[%s2249_s1 + $0x10] sm:$0xff] }
   0x2   :  { %v45_v2 = vld [vmem:[%s2249_s1] sm:$0xff]  ;;  %1558 = vmatprep.subr.mxu0 %v62_v0  ;;  %v46_v3 = vld [vmem:[%s2249_s1 + $0x8] sm:$0xff]  ;;  %v48_v5 = vld [vmem:[%s2249_s1 + $0x18] sm:$0xff] }
   0x3   :  { %1562 = vmatprep.mubr.msk.f32.mxu0 %vm63_vm0, %v45_v2  ;;  %1559 = vmatpush3.msra.mxu0 %v62_v0  ;;  %v49_v6 = vld [vmem:[%s2249_s1 + $0x20] sm:$0xff]  ;;  %v50_v7 = vld [vmem:[%s2249_s1 + $0x28] sm:$0xff]  ;;  %v51_v8 = vld [vmem:[%s2249_s1 + $0x30] sm:$0xff] }
   0x4   :  { %1560 = vmatprep.subr.mxu0 %v61_v1  ;;  %v52_v9 = vld [vmem:[%s2249_s1 + $0x38] sm:$0xff]  ;;  %v53_v10 = vld [vmem:[%s2249_s1 + $0x40] sm:$0xff]  ;;  %v54_v11 = vld [vmem:[%s2249_s1 + $0x48] sm:$0xff] }
   0x5   :  { %1561 = vmatpush3.msra.mxu0 %v61_v1  ;;  %v55_v12 = vld [vmem:[%s2249_s1 + $0x50] sm:$0xff]  ;;  %v56_v13 = vld [vmem:[%s2249_s1 + $0x58] sm:$0xff]  ;;  %v57_v14 = vld [vmem:[%s2249_s1 + $0x60] sm:$0xff] }
   0x6   :  { %1563 = vmatmul.mubr.msk.f32.vlgmr.msra.gmra.mxu0 %vm63_vm0, %v46_v3  ;;  %v58_v15 = vld [vmem:[%s2249_s1 + $0x68] sm:$0xff]  ;;  %v59_v16 = vld [vmem:[%s2249_s1 + $0x70] sm:$0xff]  ;;  %v60_v17 = vld [vmem:[%s2249_s1 + $0x78] sm:$0xff] }
   0x7   :  { %1565 = vmatprep.mubr.msk.f32.mxu0 %vm63_vm0, %v47_v4  ;;  %v1930_v18 = vld [vmem:[%s2250_s0] sm:$0xff]  ;;  %v428_v19 = vld [vmem:[%s2251_s4 + $0x18] sm:$0xff]  ;;  %v427_v20 = vld [vmem:[%s2251_s4 + $0x10] sm:$0xff] }
   0x8   :  { %1618 = vmatprep.mubr.f32.mxu1 %v1930_v18  ;;  %1642 = vmatprep.subr.mxu0 %v428_v19  ;;  %v426_v21 = vld [vmem:[%s2251_s4 + $0x8] sm:$0xff]  ;;  %v1950_v39 = vld [vmem:[%s2250_s0 + $0x10] sm:$0xff]  ;;  %v1957_v40 = vld [vmem:[%s2250_s0 + $0x18] sm:$0xff] }
   0x9   :  { %1643 = vmatpush3.msra.mxu0 %v428_v19  ;;  %v1945_v38 = vld [vmem:[%s2250_s0 + $0x8] sm:$0xff]  ;;  %v1962_v41 = vld [vmem:[%s2250_s0 + $0x20] sm:$0xff]  ;;  %v1974_v43 = vld [vmem:[%s2250_s0 + $0x30] sm:$0xff] }
   0xa   :  { %1566 = vmatmul.mubr.msk.f32.gmra.mxu0 %vm63_vm0, %v48_v5  ;;  %1644 = vmatprep.subr.mxu0 %v427_v20  ;;  %v1969_v42 = vld [vmem:[%s2250_s0 + $0x28] sm:$0xff]  ;;  %v1981_v44 = vld [vmem:[%s2250_s0 + $0x38] sm:$0xff]  ;;  %v1986_v45 = vld [vmem:[%s2250_s0 + $0x40] sm:$0xff] }
   0xb   :  { %1568 = vmatprep.mubr.msk.f32.mxu0 %vm63_vm0, %v49_v6  ;;  %1645 = vmatpush3.msra.mxu0 %v427_v20  ;;  %v1993_v46 = vld [vmem:[%s2250_s0 + $0x48] sm:$0xff]  ;;  %v1998_v47 = vld [vmem:[%s2250_s0 + $0x50] sm:$0xff]  ;;  %v2005_v48 = vld [vmem:[%s2250_s0 + $0x58] sm:$0xff] }
   0xc   :  { %1646 = vmatprep.subr.mxu0 %v426_v21  ;;  %v2010_v49 = vld [vmem:[%s2250_s0 + $0x60] sm:$0xff]  ;;  %v2017_v50 = vld [vmem:[%s2250_s0 + $0x68] sm:$0xff]  ;;  %v2022_v51 = vld [vmem:[%s2250_s0 + $0x70] sm:$0xff] }
   0xd   :  { %1647 = vmatpush3.msra.mxu0 %v426_v21  ;;  %v2029_v52 = vld [vmem:[%s2250_s0 + $0x78] sm:$0xff]  ;;  %v425_v53 = vld [vmem:[%s2251_s4] sm:$0xff] }
   0xe   :  { %1569 = vmatmul.mubr.msk.f32.gmra.mxu0 %vm63_vm0, %v50_v7  ;;  %1648 = vmatprep.subr.mxu0 %v425_v53  ;;  %v1333_v54 = vld [vmem:[%s2252_s3] ss:$0 sm:$0xff] }
   0xf   :  { %1571 = vmatprep.mubr.msk.f32.mxu0 %vm63_vm0, %v51_v8  ;;  %1649 = vmatpush3.msra.mxu0 %v425_v53 }
  0x12   :  { %1572 = vmatmul.mubr.msk.f32.gmra.mxu0 %vm63_vm0, %v52_v9 }
  0x13   :  { %1574 = vmatprep.mubr.msk.f32.mxu0 %vm63_vm0, %v53_v10 }
  0x16   :  { %1575 = vmatmul.mubr.msk.f32.gmra.mxu0 %vm63_vm0, %v54_v11 }
  0x17   :  { %1577 = vmatprep.mubr.msk.f32.mxu0 %vm63_vm0, %v55_v12 }
  0x1a   :  { %1578 = vmatmul.mubr.msk.f32.gmra.mxu0 %vm63_vm0, %v56_v13 }
  0x1b   :  { %1580 = vmatprep.mubr.msk.f32.mxu0 %vm63_vm0, %v57_v14 }
  0x1e   :  { %1581 = vmatmul.mubr.msk.f32.gmra.mxu0 %vm63_vm0, %v58_v15 }
  0x1f   :  { %1583 = vmatprep.mubr.msk.f32.mxu0 %vm63_vm0, %v59_v16 }
  0x22   :  { %1584 = vmatmul.mubr.msk.f32.gmra.mxu0 %vm63_vm0, %v60_v17 }
  0xc6   :  { %v1564_v22 = vpop.f32.mrf.mxu0 }
  0xc8   :  { %v178_v23 = vpop.f32.mrf.mxu0 }
  0xca   :  { %v1567_v24 = vpop.f32.mrf.mxu0 }
  0xcc   :  { %v188_v25 = vpop.f32.mrf.mxu0 }
  0xce   :  { %v1570_v26 = vpop.f32.mrf.mxu0 }
  0xd0   :  { %v198_v27 = vpop.f32.mrf.mxu0 }
  0xd2   :  { %v1573_v28 = vpop.f32.mrf.mxu0 }
  0xd4   :  { %v208_v29 = vpop.f32.mrf.mxu0 }
  0xd6   :  { %v1576_v30 = vpop.f32.mrf.mxu0 }
  0xd8   :  { %v218_v31 = vpop.f32.mrf.mxu0 }
  0xda   :  { %v1579_v32 = vpop.f32.mrf.mxu0 }
  0xdc   :  { %v228_v33 = vpop.f32.mrf.mxu0 }
  0xde   :  { %v1582_v34 = vpop.f32.mrf.mxu0 }
  0xe0   :  { %v238_v35 = vpop.f32.mrf.mxu0 }
  0xe2   :  { %v1585_v36 = vpop.f32.mrf.mxu0 }
  0xe3   :  { %1586 = vmatprep.subr.mxu1 %v1585_v36 }
  0xe4   :  { %v248_v37 = vpop.f32.mrf.mxu0  ;;  %1587 = vmatpush3.msra.mxu1 %v1585_v36 }
  0xe5   :  { %1588 = vmatprep.subr.mxu1 %v248_v37 }
  0xe6   :  { %1589 = vmatpush3.msra.mxu1 %v248_v37 }
  0xe7   :  { %1590 = vmatprep.subr.mxu1 %v1582_v34 }
  0xe8   :  { %1591 = vmatpush3.msra.mxu1 %v1582_v34 }
  0xe9   :  { %1592 = vmatprep.subr.mxu1 %v238_v35 }
  0xea   :  { %1593 = vmatpush3.msra.mxu1 %v238_v35 }
  0xeb   :  { %1594 = vmatprep.subr.mxu1 %v1579_v32 }
  0xec   :  { %1595 = vmatpush3.msra.mxu1 %v1579_v32 }
  0xed   :  { %1596 = vmatprep.subr.mxu1 %v228_v33 }
  0xee   :  { %1597 = vmatpush3.msra.mxu1 %v228_v33 }
  0xef   :  { %1598 = vmatprep.subr.mxu1 %v1576_v30 }
  0xf0   :  { %1599 = vmatpush3.msra.mxu1 %v1576_v30 }
  0xf1   :  { %1600 = vmatprep.subr.mxu1 %v218_v31 }
  0xf2   :  { %1601 = vmatpush3.msra.mxu1 %v218_v31 }
  0xf3   :  { %1602 = vmatprep.subr.mxu1 %v1573_v28 }
  0xf4   :  { %1603 = vmatpush3.msra.mxu1 %v1573_v28 }
  0xf5   :  { %1604 = vmatprep.subr.mxu1 %v208_v29 }
  0xf6   :  { %1605 = vmatpush3.msra.mxu1 %v208_v29 }
  0xf7   :  { %1606 = vmatprep.subr.mxu1 %v1570_v26 }
  0xf8   :  { %1607 = vmatpush3.msra.mxu1 %v1570_v26 }
  0xf9   :  { %1608 = vmatprep.subr.mxu1 %v198_v27 }
  0xfa   :  { %1609 = vmatpush3.msra.mxu1 %v198_v27 }
  0xfb   :  { %1610 = vmatprep.subr.mxu1 %v1567_v24 }
  0xfc   :  { %1611 = vmatpush3.msra.mxu1 %v1567_v24 }
  0xfd   :  { %1612 = vmatprep.subr.mxu1 %v188_v25 }
  0xfe   :  { %1613 = vmatpush3.msra.mxu1 %v188_v25 }
  0xff   :  { %1614 = vmatprep.subr.mxu1 %v1564_v22 }
 0x100   :  { %1615 = vmatpush3.msra.mxu1 %v1564_v22 }
 0x101   :  { %1616 = vmatprep.subr.mxu1 %v178_v23 }
 0x102   :  { %1617 = vmatpush3.msra.mxu1 %v178_v23 }
 0x103   :  { %1619 = vmatmul.mubr.f32.vlgmr.msra.gmra.mxu1 %v1945_v38 }
 0x104   :  { %1621 = vmatprep.mubr.f32.mxu1 %v1950_v39 }
 0x107   :  { %1622 = vmatmul.mubr.f32.gmra.mxu1 %v1957_v40 }
 0x108   :  { %1624 = vmatprep.mubr.f32.mxu1 %v1962_v41 }
 0x10b   :  { %1625 = vmatmul.mubr.f32.gmra.mxu1 %v1969_v42 }
 0x10c   :  { %1627 = vmatprep.mubr.f32.mxu1 %v1974_v43 }
 0x10f   :  { %1628 = vmatmul.mubr.f32.gmra.mxu1 %v1981_v44 }
 0x110   :  { %1630 = vmatprep.mubr.f32.mxu1 %v1986_v45 }
 0x113   :  { %1631 = vmatmul.mubr.f32.gmra.mxu1 %v1993_v46 }
 0x114   :  { %1633 = vmatprep.mubr.f32.mxu1 %v1998_v47 }
 0x117   :  { %1634 = vmatmul.mubr.f32.gmra.mxu1 %v2005_v48 }
 0x118   :  { %1636 = vmatprep.mubr.f32.mxu1 %v2010_v49 }
 0x11b   :  { %1637 = vmatmul.mubr.f32.gmra.mxu1 %v2017_v50 }
 0x11c   :  { %1639 = vmatprep.mubr.f32.mxu1 %v2022_v51 }
 0x11f   :  { %1640 = vmatmul.mubr.f32.gmra.mxu1 %v2029_v52 }
 0x120   :  { %1706 = vmatprep.mubr.f32.mxu1 %v1930_v18 }
 0x1c3   :  { %v1620_v55 = vpop.f32.mrf.mxu1 }
 0x1c4   :  { %v336_v56 = vadd.f32 %v1620_v55, %v1333_v54  ;;  %v775_v55 = vld [vmem:[%s2253_s6] sm:$0xff] }
 0x1c5   :  { %v330_v57 = vpop.f32.mrf.mxu1  ;;  %1730 = vmatprep.subr.mxu0 %v775_v55 }
 0x1c6   :  { %v331_v58 = vadd.f32 %v1333_v54, %v330_v57  ;;  %v410_v61 = vmax.f32 %v336_v56, 0.0 }
 0x1c7   :  { %v1623_v59 = vpop.f32.mrf.mxu1 }
 0x1c8   :  { %v409_v60 = vmax.f32 %v331_v58, 0.0  ;;  %v346_v62 = vadd.f32 %v1623_v59, %v1333_v54 }
 0x1c9   :  { %v340_v63 = vpop.f32.mrf.mxu1 }
 0x1ca   :  { %v341_v0 = vadd.f32 %v1333_v54, %v340_v63  ;;  %1650 = vmatprep.mubr.msk.f32.mxu0 %vm429_vm1, %v409_v60  ;;  %v412_v3 = vmax.f32 %v346_v62, 0.0 }
 0x1cb   :  { %v1626_v1 = vpop.f32.mrf.mxu1  ;;  %1651 = vmatmul.mubr.msk.f32.vlgmr.msra.gmra.mxu0 %vm429_vm1, %v410_v61 }
 0x1cc   :  { %v411_v2 = vmax.f32 %v341_v0, 0.0  ;;  %v356_v4 = vadd.f32 %v1626_v1, %v1333_v54  ;;  %1731 = vmatpush3.msra.mxu0 %v775_v55 }
 0x1cd   :  { %v350_v5 = vpop.f32.mrf.mxu1 }
 0x1ce   :  { %v351_v6 = vadd.f32 %v1333_v54, %v350_v5  ;;  %1653 = vmatprep.mubr.msk.f32.mxu0 %vm429_vm1, %v411_v2  ;;  %v414_v9 = vmax.f32 %v356_v4, 0.0 }
 0x1cf   :  { %v1629_v7 = vpop.f32.mrf.mxu1  ;;  %1654 = vmatmul.mubr.msk.f32.gmra.mxu0 %vm429_vm1, %v412_v3 }
 0x1d0   :  { %v413_v8 = vmax.f32 %v351_v6, 0.0  ;;  %v366_v10 = vadd.f32 %v1629_v7, %v1333_v54 }
 0x1d1   :  { %v360_v11 = vpop.f32.mrf.mxu1 }
 0x1d2   :  { %v361_v12 = vadd.f32 %v1333_v54, %v360_v11  ;;  %1656 = vmatprep.mubr.msk.f32.mxu0 %vm429_vm1, %v413_v8  ;;  %v416_v15 = vmax.f32 %v366_v10, 0.0 }
 0x1d3   :  { %v1632_v13 = vpop.f32.mrf.mxu1  ;;  %1657 = vmatmul.mubr.msk.f32.gmra.mxu0 %vm429_vm1, %v414_v9 }
 0x1d4   :  { %v415_v14 = vmax.f32 %v361_v12, 0.0  ;;  %v376_v16 = vadd.f32 %v1632_v13, %v1333_v54 }
 0x1d5   :  { %v370_v17 = vpop.f32.mrf.mxu1 }
 0x1d6   :  { %v371_v18 = vadd.f32 %v1333_v54, %v370_v17  ;;  %1659 = vmatprep.mubr.msk.f32.mxu0 %vm429_vm1, %v415_v14  ;;  %v418_v21 = vmax.f32 %v376_v16, 0.0 }
 0x1d7   :  { %v1635_v19 = vpop.f32.mrf.mxu1  ;;  %1660 = vmatmul.mubr.msk.f32.gmra.mxu0 %vm429_vm1, %v416_v15 }
 0x1d8   :  { %v417_v20 = vmax.f32 %v371_v18, 0.0  ;;  %v386_v22 = vadd.f32 %v1635_v19, %v1333_v54 }
 0x1d9   :  { %v380_v23 = vpop.f32.mrf.mxu1 }
 0x1da   :  { %v381_v24 = vadd.f32 %v1333_v54, %v380_v23  ;;  %1662 = vmatprep.mubr.msk.f32.mxu0 %vm429_vm1, %v417_v20  ;;  %v420_v27 = vmax.f32 %v386_v22, 0.0 }
 0x1db   :  { %v1638_v25 = vpop.f32.mrf.mxu1  ;;  %1663 = vmatmul.mubr.msk.f32.gmra.mxu0 %vm429_vm1, %v418_v21 }
 0x1dc   :  { %v419_v26 = vmax.f32 %v381_v24, 0.0  ;;  %v396_v28 = vadd.f32 %v1638_v25, %v1333_v54 }
 0x1dd   :  { %v390_v29 = vpop.f32.mrf.mxu1 }
 0x1de   :  { %v391_v30 = vadd.f32 %v1333_v54, %v390_v29  ;;  %1665 = vmatprep.mubr.msk.f32.mxu0 %vm429_vm1, %v419_v26  ;;  %v422_v33 = vmax.f32 %v396_v28, 0.0 }
 0x1df   :  { %v1641_v31 = vpop.f32.mrf.mxu1  ;;  %1666 = vmatmul.mubr.msk.f32.gmra.mxu0 %vm429_vm1, %v420_v27 }
 0x1e0   :  { %v421_v32 = vmax.f32 %v391_v30, 0.0  ;;  %v406_v34 = vadd.f32 %v1641_v31, %v1333_v54 }
 0x1e1   :  { %v400_v35 = vpop.f32.mrf.mxu1 }
 0x1e2   :  { %v401_v36 = vadd.f32 %v1333_v54, %v400_v35  ;;  %1668 = vmatprep.mubr.msk.f32.mxu0 %vm429_vm1, %v421_v32  ;;  %v424_v53 = vmax.f32 %v406_v34, 0.0 }
 0x1e3   :  { %1669 = vmatmul.mubr.msk.f32.gmra.mxu0 %vm429_vm1, %v422_v33 }
 0x1e4   :  { %v423_v37 = vmax.f32 %v401_v36, 0.0 }
 0x1e6   :  { %1671 = vmatprep.mubr.msk.f32.mxu0 %vm429_vm1, %v423_v37 }
 0x1e7   :  { %1672 = vmatmul.mubr.msk.f32.gmra.mxu0 %vm429_vm1, %v424_v53 }
 0x28b   :  { %v1652_v56 = vpop.f32.mrf.mxu0 }
 0x28d   :  { %v544_v57 = vpop.f32.mrf.mxu0 }
 0x28f   :  { %v1655_v58 = vpop.f32.mrf.mxu0 }
 0x291   :  { %v554_v54 = vpop.f32.mrf.mxu0 }
 0x293   :  { %v1658_v59 = vpop.f32.mrf.mxu0 }
 0x295   :  { %v564_v60 = vpop.f32.mrf.mxu0 }
 0x297   :  { %v1661_v61 = vpop.f32.mrf.mxu0 }
 0x299   :  { %v574_v62 = vpop.f32.mrf.mxu0 }
 0x29b   :  { %v1664_v63 = vpop.f32.mrf.mxu0 }
 0x29d   :  { %v584_v0 = vpop.f32.mrf.mxu0 }
 0x29f   :  { %v1667_v1 = vpop.f32.mrf.mxu0 }
 0x2a1   :  { %v594_v2 = vpop.f32.mrf.mxu0 }
 0x2a3   :  { %v1670_v3 = vpop.f32.mrf.mxu0 }
 0x2a5   :  { %v604_v4 = vpop.f32.mrf.mxu0 }
 0x2a7   :  { %v1673_v5 = vpop.f32.mrf.mxu0 }
 0x2a8   :  { %1674 = vmatprep.subr.mxu1 %v1673_v5 }
 0x2a9   :  { %v614_v6 = vpop.f32.mrf.mxu0  ;;  %1675 = vmatpush3.msra.mxu1 %v1673_v5 }
 0x2aa   :  { %1676 = vmatprep.subr.mxu1 %v614_v6 }
 0x2ab   :  { %1677 = vmatpush3.msra.mxu1 %v614_v6 }
 0x2ac   :  { %1678 = vmatprep.subr.mxu1 %v1670_v3 }
 0x2ad   :  { %1679 = vmatpush3.msra.mxu1 %v1670_v3  ;;  %v2152_v3 = vld [vmem:[%s2255_s7] ss:$0 sm:$0xff] }
 0x2ae   :  { %1680 = vmatprep.subr.mxu1 %v604_v4 }
 0x2af   :  { %1681 = vmatpush3.msra.mxu1 %v604_v4 }
 0x2b0   :  { %1682 = vmatprep.subr.mxu1 %v1667_v1 }
 0x2b1   :  { %1683 = vmatpush3.msra.mxu1 %v1667_v1  ;;  %v1811_v1 = vmov 0.0  }
 0x2b2   :  { %1684 = vmatprep.subr.mxu1 %v594_v2 }
 0x2b3   :  { %1685 = vmatpush3.msra.mxu1 %v594_v2 }
 0x2b4   :  { %1686 = vmatprep.subr.mxu1 %v1664_v63 }
 0x2b5   :  { %1687 = vmatpush3.msra.mxu1 %v1664_v63 }
 0x2b6   :  { %1688 = vmatprep.subr.mxu1 %v584_v0 }
 0x2b7   :  { %1689 = vmatpush3.msra.mxu1 %v584_v0 }
 0x2b8   :  { %1690 = vmatprep.subr.mxu1 %v1661_v61 }
 0x2b9   :  { %1691 = vmatpush3.msra.mxu1 %v1661_v61 }
 0x2ba   :  { %1692 = vmatprep.subr.mxu1 %v574_v62 }
 0x2bb   :  { %1693 = vmatpush3.msra.mxu1 %v574_v62 }
 0x2bc   :  { %1694 = vmatprep.subr.mxu1 %v1658_v59 }
 0x2bd   :  { %1695 = vmatpush3.msra.mxu1 %v1658_v59 }
 0x2be   :  { %1696 = vmatprep.subr.mxu1 %v564_v60 }
 0x2bf   :  { %1697 = vmatpush3.msra.mxu1 %v564_v60 }
 0x2c0   :  { %1698 = vmatprep.subr.mxu1 %v1655_v58 }
 0x2c1   :  { %1699 = vmatpush3.msra.mxu1 %v1655_v58 }
 0x2c2   :  { %1700 = vmatprep.subr.mxu1 %v554_v54 }
 0x2c3   :  { %1701 = vmatpush3.msra.mxu1 %v554_v54 }
 0x2c4   :  { %1702 = vmatprep.subr.mxu1 %v1652_v56 }
 0x2c5   :  { %1703 = vmatpush3.msra.mxu1 %v1652_v56 }
 0x2c6   :  { %1704 = vmatprep.subr.mxu1 %v544_v57 }
 0x2c7   :  { %1705 = vmatpush3.msra.mxu1 %v544_v57 }
 0x2c8   :  { %1707 = vmatmul.mubr.f32.vlgmr.msra.gmra.mxu1 %v1945_v38  ;;  %v977_v38 = vlaneseq }
 0x2c9   :  { %1709 = vmatprep.mubr.f32.mxu1 %v1950_v39 }
 0x2ca   :  { %v980_v39 = vshrl.u32 %v977_v38, 7 }
 0x2cc   :  { %1710 = vmatmul.mubr.f32.gmra.mxu1 %v1957_v40  ;;  %v2073_v40 = vand.u32 127, %v977_v38 }
 0x2cd   :  { %1712 = vmatprep.mubr.f32.mxu1 %v1962_v41  ;;  %v984_v41 = vadd.s32 8, %v980_v39 }
 0x2ce   :  { %vm981_vm3 = vcmp.eq.s32.totalorder %v2073_v40, %v980_v39  ;;  %vm988_vm5 = vcmp.eq.s32.totalorder %v2073_v40, 16 }
 0x2cf   :  { %vm985_vm2 = vcmp.eq.s32.totalorder %v2073_v40, %v984_v41  ;;  %v2147_v2 = vsel %vm988_vm5, 1.0, %v1811_v1 }
 0x2d0   :  { %1713 = vmatmul.mubr.f32.gmra.mxu1 %v1969_v42  ;;  %v1810_v42 = vmov 1.0  }
 0x2d1   :  { %1715 = vmatprep.mubr.f32.mxu1 %v1974_v43  ;;  %1756 = vmatprep.subr.msk.mxu1 %vm985_vm2, %v1810_v42 }
 0x2d2   :  { %1757 = vmatpush3.msk.msra.mxu1 %vm985_vm2, %v1810_v42  ;;  %1782 = vmatprep.subr.msk.mxu0 %vm981_vm3, %v1810_v42 }
 0x2d4   :  { %1716 = vmatmul.mubr.f32.gmra.mxu1 %v1981_v44  ;;  %v1350_v44 = vld [vmem:[%s2254_s5] ss:$0 sm:$0xff] }
 0x2d5   :  { %1718 = vmatprep.mubr.f32.mxu1 %v1986_v45 }
 0x2d8   :  { %1719 = vmatmul.mubr.f32.gmra.mxu1 %v1993_v46 }
 0x2d9   :  { %1721 = vmatprep.mubr.f32.mxu1 %v1998_v47 }
 0x2dc   :  { %1722 = vmatmul.mubr.f32.gmra.mxu1 %v2005_v48 }
 0x2dd   :  { %1724 = vmatprep.mubr.f32.mxu1 %v2010_v49 }
 0x2e0   :  { %1725 = vmatmul.mubr.f32.gmra.mxu1 %v2017_v50 }
 0x2e1   :  { %1727 = vmatprep.mubr.f32.mxu1 %v2022_v51 }
 0x2e4   :  { %1728 = vmatmul.mubr.f32.gmra.mxu1 %v2029_v52 }
 0x388   :  { %v1708_v43 = vpop.f32.mrf.mxu1 }
 0x389   :  { %v2084_v47 = vadd.f32 %v1708_v43, %v1350_v44 }
 0x38a   :  { %v696_v45 = vpop.f32.mrf.mxu1 }
 0x38b   :  { %v2082_v46 = vadd.f32 %v1350_v44, %v696_v45 }
 0x38c   :  { %v1711_v48 = vpop.f32.mrf.mxu1 }
 0x38d   :  { %1732 = vmatprep.mubr.msk.f32.mxu0 %vm783_vm4, %v2082_v46  ;;  %1758 = vmatprep.mubr.msk.f32.mxu1 %vm783_vm4, %v2082_v46  ;;  %v712_v51 = vadd.f32 %v1711_v48, %v1350_v44 }
 0x38e   :  { %v706_v49 = vpop.f32.mrf.mxu1  ;;  %1733 = vmatmul.mubr.msk.f32.vlgmr.msra.gmra.mxu0 %vm783_vm4, %v2084_v47  ;;  %1759 = vmatmul.mubr.msk.f32.vlgmr.msra.gmra.mxu1 %vm783_vm4, %v2084_v47 }
 0x38f   :  { %v707_v50 = vadd.f32 %v1350_v44, %v706_v49  ;;  %1783 = vmatpush3.msk.msra.mxu0 %vm981_vm3, %v1810_v42 }
 0x390   :  { %v1714_v52 = vpop.f32.mrf.mxu1 }
 0x391   :  { %1735 = vmatprep.mubr.msk.f32.mxu0 %vm783_vm4, %v707_v50  ;;  %1761 = vmatprep.mubr.msk.f32.mxu1 %vm783_vm4, %v707_v50  ;;  %v722_v9 = vadd.f32 %v1714_v52, %v1350_v44 }
 0x392   :  { %v716_v7 = vpop.f32.mrf.mxu1  ;;  %1736 = vmatmul.mubr.msk.f32.gmra.mxu0 %vm783_vm4, %v712_v51  ;;  %1762 = vmatmul.mubr.msk.f32.gmra.mxu1 %vm783_vm4, %v712_v51 }
 0x393   :  { %v717_v8 = vadd.f32 %v1350_v44, %v716_v7 }
 0x394   :  { %v1717_v10 = vpop.f32.mrf.mxu1 }
 0x395   :  { %1738 = vmatprep.mubr.msk.f32.mxu0 %vm783_vm4, %v717_v8  ;;  %1764 = vmatprep.mubr.msk.f32.mxu1 %vm783_vm4, %v717_v8  ;;  %v732_v13 = vadd.f32 %v1717_v10, %v1350_v44 }
 0x396   :  { %v726_v11 = vpop.f32.mrf.mxu1  ;;  %1739 = vmatmul.mubr.msk.f32.gmra.mxu0 %vm783_vm4, %v722_v9  ;;  %1765 = vmatmul.mubr.msk.f32.gmra.mxu1 %vm783_vm4, %v722_v9 }
 0x397   :  { %v727_v12 = vadd.f32 %v1350_v44, %v726_v11 }
 0x398   :  { %v1720_v14 = vpop.f32.mrf.mxu1 }
 0x399   :  { %1741 = vmatprep.mubr.msk.f32.mxu0 %vm783_vm4, %v727_v12  ;;  %1767 = vmatprep.mubr.msk.f32.mxu1 %vm783_vm4, %v727_v12  ;;  %v742_v17 = vadd.f32 %v1720_v14, %v1350_v44 }
 0x39a   :  { %v736_v15 = vpop.f32.mrf.mxu1  ;;  %1742 = vmatmul.mubr.msk.f32.gmra.mxu0 %vm783_vm4, %v732_v13  ;;  %1768 = vmatmul.mubr.msk.f32.gmra.mxu1 %vm783_vm4, %v732_v13 }
 0x39b   :  { %v737_v16 = vadd.f32 %v1350_v44, %v736_v15 }
 0x39c   :  { %v1723_v18 = vpop.f32.mrf.mxu1 }
 0x39d   :  { %1744 = vmatprep.mubr.msk.f32.mxu0 %vm783_vm4, %v737_v16  ;;  %1770 = vmatprep.mubr.msk.f32.mxu1 %vm783_vm4, %v737_v16  ;;  %v752_v21 = vadd.f32 %v1723_v18, %v1350_v44 }
 0x39e   :  { %v746_v19 = vpop.f32.mrf.mxu1  ;;  %1745 = vmatmul.mubr.msk.f32.gmra.mxu0 %vm783_vm4, %v742_v17  ;;  %1771 = vmatmul.mubr.msk.f32.gmra.mxu1 %vm783_vm4, %v742_v17 }
 0x39f   :  { %v747_v20 = vadd.f32 %v1350_v44, %v746_v19 }
 0x3a0   :  { %v1726_v22 = vpop.f32.mrf.mxu1 }
 0x3a1   :  { %1747 = vmatprep.mubr.msk.f32.mxu0 %vm783_vm4, %v747_v20  ;;  %1773 = vmatprep.mubr.msk.f32.mxu1 %vm783_vm4, %v747_v20  ;;  %v762_v25 = vadd.f32 %v1726_v22, %v1350_v44 }
 0x3a2   :  { %v756_v23 = vpop.f32.mrf.mxu1  ;;  %1748 = vmatmul.mubr.msk.f32.gmra.mxu0 %vm783_vm4, %v752_v21  ;;  %1774 = vmatmul.mubr.msk.f32.gmra.mxu1 %vm783_vm4, %v752_v21 }
 0x3a3   :  { %v757_v24 = vadd.f32 %v1350_v44, %v756_v23 }
 0x3a4   :  { %v1729_v26 = vpop.f32.mrf.mxu1 }
 0x3a5   :  { %1750 = vmatprep.mubr.msk.f32.mxu0 %vm783_vm4, %v757_v24  ;;  %1776 = vmatprep.mubr.msk.f32.mxu1 %vm783_vm4, %v757_v24  ;;  %v772_v29 = vadd.f32 %v1729_v26, %v1350_v44 }
 0x3a6   :  { %v766_v27 = vpop.f32.mrf.mxu1  ;;  %1751 = vmatmul.mubr.msk.f32.gmra.mxu0 %vm783_vm4, %v762_v25  ;;  %1777 = vmatmul.mubr.msk.f32.gmra.mxu1 %vm783_vm4, %v762_v25 }
 0x3a7   :  { %v767_v28 = vadd.f32 %v1350_v44, %v766_v27 }
 0x3a9   :  { %1753 = vmatprep.mubr.msk.f32.mxu0 %vm783_vm4, %v767_v28  ;;  %1779 = vmatprep.mubr.msk.f32.mxu1 %vm783_vm4, %v767_v28 }
 0x3aa   :  { %1754 = vmatmul.mubr.msk.f32.gmra.mxu0 %vm783_vm4, %v772_v29  ;;  %1780 = vmatmul.mubr.msk.f32.gmra.mxu1 %vm783_vm4, %v772_v29 }
 0x3ab   :  { %1784 = vmatprep.mubr.msk.f32.mxu0 %vm783_vm4, %v2082_v46 }
 0x3ae   :  { %1785 = vmatmul.mubr.msk.f32.vlgmr.msra.gmra.mxu0 %vm783_vm4, %v2084_v47 }
 0x3af   :  { %1787 = vmatprep.mubr.msk.f32.mxu0 %vm783_vm4, %v707_v50 }
 0x3b2   :  { %1788 = vmatmul.mubr.msk.f32.gmra.mxu0 %vm783_vm4, %v712_v51 }
 0x3b3   :  { %1790 = vmatprep.mubr.msk.f32.mxu0 %vm783_vm4, %v717_v8 }
 0x3b6   :  { %1791 = vmatmul.mubr.msk.f32.gmra.mxu0 %vm783_vm4, %v722_v9 }
 0x3b7   :  { %1793 = vmatprep.mubr.msk.f32.mxu0 %vm783_vm4, %v727_v12 }
 0x3ba   :  { %1794 = vmatmul.mubr.msk.f32.gmra.mxu0 %vm783_vm4, %v732_v13 }
 0x3bb   :  { %1796 = vmatprep.mubr.msk.f32.mxu0 %vm783_vm4, %v737_v16 }
 0x3be   :  { %1797 = vmatmul.mubr.msk.f32.gmra.mxu0 %vm783_vm4, %v742_v17 }
 0x3bf   :  { %1799 = vmatprep.mubr.msk.f32.mxu0 %vm783_vm4, %v747_v20 }
 0x3c2   :  { %1800 = vmatmul.mubr.msk.f32.gmra.mxu0 %vm783_vm4, %v752_v21 }
 0x3c3   :  { %1802 = vmatprep.mubr.msk.f32.mxu0 %vm783_vm4, %v757_v24 }
 0x3c6   :  { %1803 = vmatmul.mubr.msk.f32.gmra.mxu0 %vm783_vm4, %v762_v25 }
 0x3c7   :  { %1805 = vmatprep.mubr.msk.f32.mxu0 %vm783_vm4, %v767_v28 }
 0x3ca   :  { %1806 = vmatmul.mubr.msk.f32.gmra.mxu0 %vm783_vm4, %v772_v29 }
 0x44e   :  { %v1734_v30 = vpop.f32.mrf.mxu0  ;;  %v1760_v31 = vpop.f32.mrf.mxu1 }
 0x44f   :  { %v904_v38 = vadd.f32 %v1734_v30, %v2152_v3  ;;  %v1063_v39 = vadd.f32 %v1760_v31, %v2147_v2 }
 0x450   :  { %v898_v32 = vpop.f32.mrf.mxu0  ;;  %v1057_v33 = vpop.f32.mrf.mxu1 }
 0x451   :  { %v899_v41 = vadd.f32 %v2152_v3, %v898_v32  ;;  %v1058_v42 = vadd.f32 %v2147_v2, %v1057_v33  ;;  %v1137_v47 = vmul.f32 %v1063_v39, %v904_v38 }
 0x452   :  { %v1737_v34 = vpop.f32.mrf.mxu0  ;;  %v1763_v35 = vpop.f32.mrf.mxu1 }
 0x453   :  { %v914_v45 = vadd.f32 %v1737_v34, %v2152_v3  ;;  %v1073_v46 = vadd.f32 %v1763_v35, %v2147_v2  ;;  %v1136_v52 = vmul.f32 %v1058_v42, %v899_v41 }
 0x454   :  { %v908_v36 = vpop.f32.mrf.mxu0  ;;  %v1067_v37 = vpop.f32.mrf.mxu1 }
 0x455   :  { %v909_v49 = vadd.f32 %v2152_v3, %v908_v36  ;;  %v1068_v50 = vadd.f32 %v2147_v2, %v1067_v37  ;;  %v1139_v12 = vmul.f32 %v1073_v46, %v914_v45 }
 0x456   :  { %v1740_v53 = vpop.f32.mrf.mxu0  ;;  %v1766_v55 = vpop.f32.mrf.mxu1 }
 0x457   :  { %v924_v9 = vadd.f32 %v1740_v53, %v2152_v3  ;;  %v1083_v10 = vadd.f32 %v1766_v55, %v2147_v2  ;;  %v1138_v17 = vmul.f32 %v1068_v50, %v909_v49 }
 0x458   :  { %v918_v56 = vpop.f32.mrf.mxu0  ;;  %v1077_v58 = vpop.f32.mrf.mxu1 }
 0x459   :  { %v919_v14 = vadd.f32 %v2152_v3, %v918_v56  ;;  %v1078_v15 = vadd.f32 %v2147_v2, %v1077_v58  ;;  %v1141_v23 = vmul.f32 %v1083_v10, %v924_v9 }
 0x45a   :  { %v1743_v57 = vpop.f32.mrf.mxu0  ;;  %v1769_v60 = vpop.f32.mrf.mxu1 }
 0x45b   :  { %v934_v20 = vadd.f32 %v1743_v57, %v2152_v3  ;;  %v1093_v21 = vadd.f32 %v1769_v60, %v2147_v2  ;;  %v1140_v28 = vmul.f32 %v1078_v15, %v919_v14 }
 0x45c   :  { %v928_v54 = vpop.f32.mrf.mxu0  ;;  %v1087_v63 = vpop.f32.mrf.mxu1 }
 0x45d   :  { %v929_v25 = vadd.f32 %v2152_v3, %v928_v54  ;;  %v1088_v26 = vadd.f32 %v2147_v2, %v1087_v63  ;;  %v1143_v34 = vmul.f32 %v1093_v21, %v934_v20 }
 0x45e   :  { %v1746_v59 = vpop.f32.mrf.mxu0  ;;  %v1772_v5 = vpop.f32.mrf.mxu1 }
 0x45f   :  { %v944_v31 = vadd.f32 %v1746_v59, %v2152_v3  ;;  %v1103_v32 = vadd.f32 %v1772_v5, %v2147_v2  ;;  %v1142_v55 = vmul.f32 %v1088_v26, %v929_v25 }
 0x460   :  { %v938_v61 = vpop.f32.mrf.mxu0  ;;  %v1097_v43 = vpop.f32.mrf.mxu1 }
 0x461   :  { %v939_v36 = vadd.f32 %v2152_v3, %v938_v61  ;;  %v1098_v37 = vadd.f32 %v2147_v2, %v1097_v43  ;;  %v1145_v60 = vmul.f32 %v1103_v32, %v944_v31 }
 0x462   :  { %v2142_v62 = vpop.f32.mrf.mxu0  ;;  %v1775_v7 = vpop.f32.mrf.mxu1 }
 0x463   :  { %v954_v58 = vadd.f32 %v2142_v62, %v2152_v3  ;;  %v1113_v54 = vadd.f32 %v1775_v7, %v2147_v2  ;;  %v1144_v62 = vmul.f32 %v1098_v37, %v939_v36 }
 0x464   :  { %v2145_v0 = vpop.f32.mrf.mxu0  ;;  %v1107_v18 = vpop.f32.mrf.mxu1 }
 0x465   :  { %v949_v63 = vadd.f32 %v2152_v3, %v2145_v0  ;;  %v1108_v1 = vadd.f32 %v2147_v2, %v1107_v18  ;;  %v1147_v43 = vmul.f32 %v1113_v54, %v954_v58 }
 0x466   :  { %v2154_v4 = vpop.f32.mrf.mxu0  ;;  %v1778_v29 = vpop.f32.mrf.mxu1 }
 0x467   :  { %v964_v41 = vadd.f32 %v2154_v4, %v2152_v3  ;;  %v1123_v42 = vadd.f32 %v1778_v29, %v2147_v2  ;;  %v1146_v4 = vmul.f32 %v1108_v1, %v949_v63 }
 0x468   :  { %v2156_v6 = vpop.f32.mrf.mxu0  ;;  %v1117_v56 = vpop.f32.mrf.mxu1 }
 0x469   :  { %v959_v46 = vadd.f32 %v2152_v3, %v2156_v6  ;;  %v1149_v7 = vmul.f32 %v1123_v42, %v964_v41 }
 0x46a   :  { %v2160_v40 = vpop.f32.mrf.mxu0  ;;  %v1781_v38 = vpop.f32.mrf.mxu1 }
 0x46c   :  { %v2164_v44 = vpop.f32.mrf.mxu0  ;;  %v1127_v49 = vpop.f32.mrf.mxu1 }
 0x46d   :  { %v969_v9 = vadd.f32 %v2152_v3, %v2164_v44  ;;  %v1128_v10 = vadd.f32 %v2147_v2, %v1127_v49 }
 0x46e   :  { %v1786_v48 = vpop.f32.mrf.mxu0 }
 0x46f   :  { %v1224_v51 = vadd.f32 %v1786_v48, %v1137_v47  ;;  %v1118_v47 = vadd.f32 %v2147_v2, %v1117_v56 }
 0x470   :  { %v1218_v8 = vpop.f32.mrf.mxu0 }
 0x471   :  { %1298 = vst [vmem:[%s2256_s8 + $0x8] sm:$0xff] %v1224_v51  ;;  %v1219_v11 = vadd.f32 %v1218_v8, %v1136_v52  ;;  %v974_v51 = vadd.f32 %v2160_v40, %v2152_v3  ;;  %v1133_v52 = vadd.f32 %v1781_v38, %v2147_v2  ;;  %v1148_v40 = vmul.f32 %v1118_v47, %v959_v46 }
 0x472   :  { %v1789_v13 = vpop.f32.mrf.mxu0  ;;  %v1150_v2 = vmul.f32 %v1128_v10, %v969_v9 }
 0x473   :  { %1297 = vst [vmem:[%s2256_s8] sm:$0xff] %v1219_v11  ;;  %v1234_v16 = vadd.f32 %v1789_v13, %v1139_v12  ;;  %v1151_v14 = vmul.f32 %v1133_v52, %v974_v51 }
 0x474   :  { %v1228_v19 = vpop.f32.mrf.mxu0 }
 0x475   :  { %1300 = vst [vmem:[%s2256_s8 + $0x18] sm:$0xff] %v1234_v16  ;;  %v1229_v22 = vadd.f32 %v1228_v19, %v1138_v17 }
 0x476   :  { %v1792_v24 = vpop.f32.mrf.mxu0 }
 0x477   :  { %1299 = vst [vmem:[%s2256_s8 + $0x10] sm:$0xff] %v1229_v22  ;;  %v1244_v27 = vadd.f32 %v1792_v24, %v1141_v23 }
 0x478   :  { %v1238_v30 = vpop.f32.mrf.mxu0 }
 0x479   :  { %1302 = vst [vmem:[%s2256_s8 + $0x28] sm:$0xff] %v1244_v27  ;;  %v1239_v33 = vadd.f32 %v1238_v30, %v1140_v28 }
 0x47a   :  { %v1795_v35 = vpop.f32.mrf.mxu0 }
 0x47b   :  { %1301 = vst [vmem:[%s2256_s8 + $0x20] sm:$0xff] %v1239_v33  ;;  %v1254_v53 = vadd.f32 %v1795_v35, %v1143_v34 }
 0x47c   :  { %v1248_v57 = vpop.f32.mrf.mxu0 }
 0x47d   :  { %1304 = vst [vmem:[%s2256_s8 + $0x38] sm:$0xff] %v1254_v53  ;;  %v1249_v59 = vadd.f32 %v1248_v57, %v1142_v55 }
 0x47e   :  { %v1798_v61 = vpop.f32.mrf.mxu0 }
 0x47f   :  { %1303 = vst [vmem:[%s2256_s8 + $0x30] sm:$0xff] %v1249_v59  ;;  %v1264_v5 = vadd.f32 %v1798_v61, %v1145_v60 }
 0x480   :  { %v1258_v39 = vpop.f32.mrf.mxu0 }
 0x481   :  { %1306 = vst [vmem:[%s2256_s8 + $0x48] sm:$0xff] %v1264_v5  ;;  %v1259_v0 = vadd.f32 %v1258_v39, %v1144_v62 }
 0x482   :  { %v1801_v45 = vpop.f32.mrf.mxu0 }
 0x483   :  { %1305 = vst [vmem:[%s2256_s8 + $0x40] sm:$0xff] %v1259_v0  ;;  %v1274_v48 = vadd.f32 %v1801_v45, %v1147_v43 }
 0x484   :  { %v1268_v50 = vpop.f32.mrf.mxu0 }
 0x485   :  { %1308 = vst [vmem:[%s2256_s8 + $0x58] sm:$0xff] %v1274_v48  ;;  %v1269_v6 = vadd.f32 %v1268_v50, %v1146_v4 }
 0x486   :  { %v1804_v8 = vpop.f32.mrf.mxu0 }
 0x487   :  { %1307 = vst [vmem:[%s2256_s8 + $0x50] sm:$0xff] %v1269_v6  ;;  %v1284_v11 = vadd.f32 %v1804_v8, %v1149_v7 }
 0x488   :  { %v1278_v12 = vpop.f32.mrf.mxu0 }
 0x489   :  { %1310 = vst [vmem:[%s2256_s8 + $0x68] sm:$0xff] %v1284_v11  ;;  %v1279_v13 = vadd.f32 %v1278_v12, %v1148_v40 }
 0x48a   :  { %v1807_v15 = vpop.f32.mrf.mxu0 }
 0x48b   :  { %1309 = vst [vmem:[%s2256_s8 + $0x60] sm:$0xff] %v1279_v13  ;;  %v1294_v3 = vadd.f32 %v1807_v15, %v1151_v14 }
 0x48c   :  { %v1288_v44 = vpop.f32.mrf.mxu0 }
 0x48d   :  { %1312 = vst [vmem:[%s2256_s8 + $0x78] sm:$0xff] %v1294_v3  ;;  %v1289_v16 = vadd.f32 %v1288_v44, %v1150_v2 }
 0x48f   :  { %1311 = vst [vmem:[%s2256_s8 + $0x70] sm:$0xff] %v1289_v16 }

// kernel: nlgnn_forward.3
= control target key start
LH: loop header
LB: loop body
LE: loop exit
PB: predicated region body
PF: predicated region fallthrough
CT: control target
= control target key end

     0   :  { %vm45_vm0 = vcmask 64512   ;;  %v3594_v2 = vmov 0.0   ;;  %s3595_s9 = smov 120   ;;  %s4331_s0 = inlined_call_operand.vmem [shape: f32[128,128], index: 0, kind: input, shape index: {}]   ;;  %s4332_s1 = inlined_call_operand.vmem [shape: f32[5,8,8], index: 1, kind: input, shape index: {}]   ;;  %s4333_s3 = inlined_call_operand.vmem [shape: f32[5,8,8], index: 3, kind: input, shape index: {}]   ;;  %s4334_s2 = inlined_call_operand.vmem [shape: f32[1,8], index: 2, kind: input, shape index: {}]   ;;  %s4335_s6 = inlined_call_operand.vmem [shape: f32[8,128], index: 6, kind: input, shape index: {}]   ;;  %s4336_s5 = inlined_call_operand.vmem [shape: f32[8,128], index: 5, kind: input, shape index: {}]   ;;  %s4337_s4 = inlined_call_operand.vmem [shape: f32[1,8], index: 4, kind: input, shape index: {}]   ;;  %s4338_s7 = inlined_call_operand.vmem [shape: f32[1,128], index: 7, kind: input, shape index: {}]   ;;  %s4339_s8 = inlined_call_operand.vmem [shape: f32[128,128], index: 8, kind: output, shape index: {}]  }
   0x1   :  { %v31_v0 = vld [vmem:[%s4331_s0 + $0x10] sm:$0xff]  ;;  %v29_v1 = vld [vmem:[%s4331_s0] sm:$0xff]  ;;  %46 = vst.msk [vmem:[#allocation2] sm:$0xff] %vm45_vm0, %v3594_v2  ;;  %47 = vst.msk [vmem:[#allocation2 + $0x88] sm:$0xff] %vm45_vm0, %v3594_v2 }
   0x2   :  { %68 = vrot.lane.b32.xlu1 %v31_v0, %s3595_s9  ;;  %64 = vrot.lane.b32.xlu0 %v29_v1, %s3595_s9  ;;  %v32_v3 = vld [vmem:[%s4331_s0 + $0x18] sm:$0xff]  ;;  %v30_v4 = vld [vmem:[%s4331_s0 + $0x8] sm:$0xff] }
   0x3   :  { %v33_v5 = vld [vmem:[%s4331_s0 + $0x20] sm:$0xff]  ;;  %v34_v6 = vld [vmem:[%s4331_s0 + $0x28] sm:$0xff]  ;;  %v2891_v9 = vld [vmem:[%s4332_s1 + $0x10] sm:$0xff] }
   0x4   :  { %v145_v7 = vld [vmem:[%s4332_s1] sm:$0xff]  ;;  %v2874_v8 = vld [vmem:[%s4332_s1 + $0x8] sm:$0xff]  ;;  %v35_v10 = vld [vmem:[%s4331_s0 + $0x30] sm:$0xff] }
   0x5   :  { %3264 = vmatprep.subr.mxu0 %v145_v7  ;;  %3290 = vmatprep.subr.mxu1 %v2874_v8  ;;  %v36_v11 = vld [vmem:[%s4331_s0 + $0x38] sm:$0xff]  ;;  %v37_v12 = vld [vmem:[%s4331_s0 + $0x40] sm:$0xff]  ;;  %v38_v13 = vld [vmem:[%s4331_s0 + $0x48] sm:$0xff] }
   0x6   :  { %70 = vrot.lane.b32.xlu1 %v32_v3, %s3595_s9  ;;  %66 = vrot.lane.b32.xlu0 %v30_v4, %s3595_s9  ;;  %v39_v14 = vld [vmem:[%s4331_s0 + $0x50] sm:$0xff]  ;;  %v40_v15 = vld [vmem:[%s4331_s0 + $0x58] sm:$0xff] }
   0x7   :  { %3265 = vmatpush3.msra.mxu0 %v145_v7  ;;  %3291 = vmatpush3.msra.mxu1 %v2874_v8  ;;  %v41_v16 = vld [vmem:[%s4331_s0 + $0x60] sm:$0xff]  ;;  %v42_v17 = vld [vmem:[%s4331_s0 + $0x68] sm:$0xff]  ;;  %v43_v18 = vld [vmem:[%s4331_s0 + $0x70] sm:$0xff] }
   0x8   :  { %3316 = vmatprep.subr.mxu0 %v2891_v9  ;;  %v44_v19 = vld [vmem:[%s4331_s0 + $0x78] sm:$0xff]  ;;  %v3734_v35 = vld [vmem:[%s4332_s1 + $0x20] sm:$0xff] }
   0x9   :  { %v2908_v20 = vld [vmem:[%s4332_s1 + $0x18] sm:$0xff] }
   0xa   :  { %72 = vrot.lane.b32.xlu0 %v33_v5, %s3595_s9  ;;  %74 = vrot.lane.b32.xlu1 %v34_v6, %s3595_s9 }
   0xb   :  { %3342 = vmatprep.subr.mxu1 %v2908_v20 }
   0xe   :  { %76 = vrot.lane.b32.xlu0 %v35_v10, %s3595_s9  ;;  %78 = vrot.lane.b32.xlu1 %v36_v11, %s3595_s9 }
  0x12   :  { %80 = vrot.lane.b32.xlu0 %v37_v12, %s3595_s9  ;;  %82 = vrot.lane.b32.xlu1 %v38_v13, %s3595_s9 }
  0x16   :  { %84 = vrot.lane.b32.xlu0 %v39_v14, %s3595_s9  ;;  %86 = vrot.lane.b32.xlu1 %v40_v15, %s3595_s9 }
  0x1a   :  { %88 = vrot.lane.b32.xlu0 %v41_v16, %s3595_s9  ;;  %90 = vrot.lane.b32.xlu1 %v42_v17, %s3595_s9 }
  0x1e   :  { %92 = vrot.lane.b32.xlu0 %v43_v18, %s3595_s9  ;;  %94 = vrot.lane.b32.xlu1 %v44_v19, %s3595_s9 }
  0x74   :  { %v69_v21 = vpop.permute.xlu1 %68  ;;  %v65_v22 = vpop.permute.xlu0 %64 }
  0x75   :  { %114 = vst.msk [vmem:[#allocation2 + $0x18] sm:$0xff] %vm45_vm0, %v69_v21  ;;  %112 = vst.msk [vmem:[#allocation2 + $0x8] sm:$0xff] %vm45_vm0, %v65_v22 }
  0x78   :  { %v71_v23 = vpop.permute.xlu1 %70  ;;  %v67_v24 = vpop.permute.xlu0 %66 }
  0x79   :  { %115 = vst.msk [vmem:[#allocation2 + $0x20] sm:$0xff] %vm45_vm0, %v71_v23  ;;  %113 = vst.msk [vmem:[#allocation2 + $0x10] sm:$0xff] %vm45_vm0, %v67_v24 }
  0x7c   :  { %v73_v25 = vpop.permute.xlu0 %72  ;;  %v129_v26 = vld [vmem:[#allocation2 + $0x6] sm:$0xff]  ;;  %v75_v28 = vpop.permute.xlu1 %74  ;;  %v590_v10 = vld [vmem:[#allocation2 + $0x18] sm:$0xff] }
  0x7d   :  { %v361_v27 = vld [vmem:[#allocation2 + $0x7] sm:$0xff]  ;;  %116 = vst.msk [vmem:[#allocation2 + $0x28] sm:$0xff] %vm45_vm0, %v73_v25  ;;  %3266 = vmatprep.mubr.msk.f32.mxu0 %vm45_vm0, %v129_v26  ;;  %117 = vst.msk [vmem:[#allocation2 + $0x30] sm:$0xff] %vm45_vm0, %v75_v28 }
  0x7e   :  { %3292 = vmatprep.mubr.msk.f32.mxu1 %vm45_vm0, %v361_v27  ;;  %v588_v6 = vld [vmem:[#allocation2 + $0x8] sm:$0xff] }
  0x80   :  { %v77_v29 = vpop.permute.xlu0 %76  ;;  %v130_v30 = vld [vmem:[#allocation2 + $0xe] sm:$0xff]  ;;  %v131_v32 = vld [vmem:[#allocation2 + $0x16] sm:$0xff]  ;;  %v79_v33 = vpop.permute.xlu1 %78  ;;  %v132_v36 = vld [vmem:[#allocation2 + $0x1e] sm:$0xff] }
  0x81   :  { %v362_v31 = vld [vmem:[#allocation2 + $0xf] sm:$0xff]  ;;  %118 = vst.msk [vmem:[#allocation2 + $0x38] sm:$0xff] %vm45_vm0, %v77_v29  ;;  %3267 = vmatmul.mubr.msk.f32.vlgmr.msra.gmra.mxu0 %vm45_vm0, %v130_v30  ;;  %v363_v34 = vld [vmem:[#allocation2 + $0x17] sm:$0xff]  ;;  %119 = vst.msk [vmem:[#allocation2 + $0x40] sm:$0xff] %vm45_vm0, %v79_v33 }
  0x82   :  { %3293 = vmatmul.mubr.msk.f32.vlgmr.msra.gmra.mxu1 %vm45_vm0, %v362_v31  ;;  %3317 = vmatpush3.msra.mxu0 %v2891_v9  ;;  %v364_v38 = vld [vmem:[#allocation2 + $0x1f] sm:$0xff]  ;;  %v815_v7 = vld [vmem:[#allocation2 + $0x9] sm:$0xff]  ;;  %v816_v9 = vld [vmem:[#allocation2 + $0x11] sm:$0xff] }
  0x83   :  { %3269 = vmatprep.mubr.msk.f32.mxu0 %vm45_vm0, %v131_v32  ;;  %3295 = vmatprep.mubr.msk.f32.mxu1 %vm45_vm0, %v363_v34  ;;  %v589_v8 = vld [vmem:[#allocation2 + $0x10] sm:$0xff]  ;;  %v817_v11 = vld [vmem:[#allocation2 + $0x19] sm:$0xff] }
  0x84   :  { %3343 = vmatpush3.msra.mxu1 %v2908_v20  ;;  %v81_v37 = vpop.permute.xlu0 %80  ;;  %v133_v39 = vld [vmem:[#allocation2 + $0x26] sm:$0xff]  ;;  %v83_v41 = vpop.permute.xlu1 %82  ;;  %3368 = vmatprep.subr.mxu0 %v3734_v35  ;;  %v134_v42 = vld [vmem:[#allocation2 + $0x2e] sm:$0xff] }
  0x85   :  { %v365_v40 = vld [vmem:[#allocation2 + $0x27] sm:$0xff]  ;;  %120 = vst.msk [vmem:[#allocation2 + $0x48] sm:$0xff] %vm45_vm0, %v81_v37  ;;  %3270 = vmatmul.mubr.msk.f32.gmra.mxu0 %vm45_vm0, %v132_v36  ;;  %121 = vst.msk [vmem:[#allocation2 + $0x50] sm:$0xff] %vm45_vm0, %v83_v41  ;;  %v366_v43 = vld [vmem:[#allocation2 + $0x2f] sm:$0xff] }
  0x86   :  { %3296 = vmatmul.mubr.msk.f32.gmra.mxu1 %vm45_vm0, %v364_v38  ;;  %3272 = vmatprep.mubr.msk.f32.mxu0 %vm45_vm0, %v133_v39  ;;  %v591_v12 = vld [vmem:[#allocation2 + $0x20] sm:$0xff]  ;;  %v592_v14 = vld [vmem:[#allocation2 + $0x28] sm:$0xff]  ;;  %v593_v16 = vld [vmem:[#allocation2 + $0x30] sm:$0xff] }
  0x87   :  { %3298 = vmatprep.mubr.msk.f32.mxu1 %vm45_vm0, %v365_v40  ;;  %v818_v13 = vld [vmem:[#allocation2 + $0x21] sm:$0xff]  ;;  %v819_v15 = vld [vmem:[#allocation2 + $0x29] sm:$0xff]  ;;  %v1043_v39 = vld [vmem:[#allocation2 + $0x12] sm:$0xff] }
  0x88   :  { %v85_v44 = vpop.permute.xlu0 %84  ;;  %v135_v45 = vld [vmem:[#allocation2 + $0x36] sm:$0xff]  ;;  %v87_v47 = vpop.permute.xlu1 %86  ;;  %v136_v48 = vld [vmem:[#allocation2 + $0x3e] sm:$0xff]  ;;  %v1042_v38 = vld [vmem:[#allocation2 + $0xa] sm:$0xff] }
  0x89   :  { %v367_v46 = vld [vmem:[#allocation2 + $0x37] sm:$0xff]  ;;  %122 = vst.msk [vmem:[#allocation2 + $0x58] sm:$0xff] %vm45_vm0, %v85_v44  ;;  %3273 = vmatmul.mubr.msk.f32.gmra.mxu0 %vm45_vm0, %v134_v42  ;;  %123 = vst.msk [vmem:[#allocation2 + $0x60] sm:$0xff] %vm45_vm0, %v87_v47  ;;  %v368_v49 = vld [vmem:[#allocation2 + $0x3f] sm:$0xff] }
  0x8a   :  { %3299 = vmatmul.mubr.msk.f32.gmra.mxu1 %vm45_vm0, %v366_v43  ;;  %3275 = vmatprep.mubr.msk.f32.mxu0 %vm45_vm0, %v135_v45  ;;  %v820_v17 = vld [vmem:[#allocation2 + $0x31] sm:$0xff]  ;;  %v821_v19 = vld [vmem:[#allocation2 + $0x39] sm:$0xff]  ;;  %v1045_v41 = vld [vmem:[#allocation2 + $0x22] sm:$0xff] }
  0x8b   :  { %3301 = vmatprep.mubr.msk.f32.mxu1 %vm45_vm0, %v367_v46  ;;  %v594_v18 = vld [vmem:[#allocation2 + $0x38] sm:$0xff]  ;;  %v595_v20 = vld [vmem:[#allocation2 + $0x40] sm:$0xff]  ;;  %v1046_v42 = vld [vmem:[#allocation2 + $0x2a] sm:$0xff] }
  0x8c   :  { %v89_v50 = vpop.permute.xlu0 %88  ;;  %v137_v51 = vld [vmem:[#allocation2 + $0x46] sm:$0xff]  ;;  %v91_v53 = vpop.permute.xlu1 %90  ;;  %v138_v54 = vld [vmem:[#allocation2 + $0x4e] sm:$0xff]  ;;  %v1044_v40 = vld [vmem:[#allocation2 + $0x1a] sm:$0xff] }
  0x8d   :  { %v369_v52 = vld [vmem:[#allocation2 + $0x47] sm:$0xff]  ;;  %124 = vst.msk [vmem:[#allocation2 + $0x68] sm:$0xff] %vm45_vm0, %v89_v50  ;;  %3276 = vmatmul.mubr.msk.f32.gmra.mxu0 %vm45_vm0, %v136_v48  ;;  %125 = vst.msk [vmem:[#allocation2 + $0x70] sm:$0xff] %vm45_vm0, %v91_v53  ;;  %v370_v55 = vld [vmem:[#allocation2 + $0x4f] sm:$0xff] }
  0x8e   :  { %3302 = vmatmul.mubr.msk.f32.gmra.mxu1 %vm45_vm0, %v368_v49  ;;  %3278 = vmatprep.mubr.msk.f32.mxu0 %vm45_vm0, %v137_v51  ;;  %v822_v21 = vld [vmem:[#allocation2 + $0x41] sm:$0xff]  ;;  %v823_v23 = vld [vmem:[#allocation2 + $0x49] sm:$0xff]  ;;  %v1047_v43 = vld [vmem:[#allocation2 + $0x32] sm:$0xff] }
  0x8f   :  { %3304 = vmatprep.mubr.msk.f32.mxu1 %vm45_vm0, %v369_v52  ;;  %v596_v22 = vld [vmem:[#allocation2 + $0x48] sm:$0xff]  ;;  %v597_v24 = vld [vmem:[#allocation2 + $0x50] sm:$0xff]  ;;  %v1048_v44 = vld [vmem:[#allocation2 + $0x3a] sm:$0xff] }
  0x90   :  { %v93_v56 = vpop.permute.xlu0 %92  ;;  %v139_v57 = vld [vmem:[#allocation2 + $0x56] sm:$0xff]  ;;  %v95_v59 = vpop.permute.xlu1 %94  ;;  %v140_v60 = vld [vmem:[#allocation2 + $0x5e] sm:$0xff]  ;;  %v1050_v46 = vld [vmem:[#allocation2 + $0x4a] sm:$0xff] }
  0x91   :  { %v371_v58 = vld [vmem:[#allocation2 + $0x57] sm:$0xff]  ;;  %126 = vst.msk [vmem:[#allocation2 + $0x78] sm:$0xff] %vm45_vm0, %v93_v56  ;;  %3279 = vmatmul.mubr.msk.f32.gmra.mxu0 %vm45_vm0, %v138_v54  ;;  %127 = vst.msk [vmem:[#allocation2 + $0x80] sm:$0xff] %vm45_vm0, %v95_v59  ;;  %v372_v61 = vld [vmem:[#allocation2 + $0x5f] sm:$0xff] }
  0x92   :  { %3305 = vmatmul.mubr.msk.f32.gmra.mxu1 %vm45_vm0, %v370_v55  ;;  %3281 = vmatprep.mubr.msk.f32.mxu0 %vm45_vm0, %v139_v57  ;;  %v824_v25 = vld [vmem:[#allocation2 + $0x51] sm:$0xff]  ;;  %v825_v27 = vld [vmem:[#allocation2 + $0x59] sm:$0xff]  ;;  %v1049_v45 = vld [vmem:[#allocation2 + $0x42] sm:$0xff] }
  0x93   :  { %3307 = vmatprep.mubr.msk.f32.mxu1 %vm45_vm0, %v371_v58  ;;  %v598_v26 = vld [vmem:[#allocation2 + $0x58] sm:$0xff]  ;;  %v599_v28 = vld [vmem:[#allocation2 + $0x60] sm:$0xff]  ;;  %v2959_v55 = vld [vmem:[%s4333_s3 + $0x8] sm:$0xff] }
  0x94   :  { %v141_v62 = vld [vmem:[#allocation2 + $0x66] sm:$0xff]  ;;  %v142_v0 = vld [vmem:[#allocation2 + $0x6e] sm:$0xff]  ;;  %v1052_v48 = vld [vmem:[#allocation2 + $0x5a] sm:$0xff] }
  0x95   :  { %v373_v63 = vld [vmem:[#allocation2 + $0x67] sm:$0xff]  ;;  %3282 = vmatmul.mubr.msk.f32.gmra.mxu0 %vm45_vm0, %v140_v60  ;;  %v374_v1 = vld [vmem:[#allocation2 + $0x6f] sm:$0xff]  ;;  %v3837_v57 = vld [vmem:[%s4333_s3 + $0x18] sm:$0xff] }
  0x96   :  { %3308 = vmatmul.mubr.msk.f32.gmra.mxu1 %vm45_vm0, %v372_v61  ;;  %3284 = vmatprep.mubr.msk.f32.mxu0 %vm45_vm0, %v141_v62  ;;  %v826_v29 = vld [vmem:[#allocation2 + $0x61] sm:$0xff]  ;;  %v827_v31 = vld [vmem:[#allocation2 + $0x69] sm:$0xff]  ;;  %v1051_v47 = vld [vmem:[#allocation2 + $0x52] sm:$0xff] }
  0x97   :  { %3310 = vmatprep.mubr.msk.f32.mxu1 %vm45_vm0, %v373_v63  ;;  %v600_v30 = vld [vmem:[#allocation2 + $0x68] sm:$0xff]  ;;  %v601_v32 = vld [vmem:[#allocation2 + $0x70] sm:$0xff]  ;;  %v1318_v54 = vld [vmem:[%s4333_s3] sm:$0xff] }
  0x98   :  { %v143_v2 = vld [vmem:[#allocation2 + $0x76] sm:$0xff]  ;;  %v144_v4 = vld [vmem:[#allocation2 + $0x7e] sm:$0xff]  ;;  %v1054_v50 = vld [vmem:[#allocation2 + $0x6a] sm:$0xff]  ;;  %3394 = vmatprep.subr.mxu1 %v1318_v54 }
  0x99   :  { %v375_v3 = vld [vmem:[#allocation2 + $0x77] sm:$0xff]  ;;  %3285 = vmatmul.mubr.msk.f32.gmra.mxu0 %vm45_vm0, %v142_v0  ;;  %v376_v5 = vld [vmem:[#allocation2 + $0x7f] sm:$0xff] }
  0x9a   :  { %3311 = vmatmul.mubr.msk.f32.gmra.mxu1 %vm45_vm0, %v374_v1  ;;  %3287 = vmatprep.mubr.msk.f32.mxu0 %vm45_vm0, %v143_v2  ;;  %v828_v33 = vld [vmem:[#allocation2 + $0x71] sm:$0xff]  ;;  %v603_v36 = vld [vmem:[#allocation2 + $0x80] sm:$0xff] }
  0x9b   :  { %3313 = vmatprep.mubr.msk.f32.mxu1 %vm45_vm0, %v375_v3  ;;  %v602_v34 = vld [vmem:[#allocation2 + $0x78] sm:$0xff]  ;;  %v830_v37 = vld [vmem:[#allocation2 + $0x81] sm:$0xff]  ;;  %v3831_v56 = vld [vmem:[%s4333_s3 + $0x10] sm:$0xff] }
  0x9c   :  { %v1053_v49 = vld [vmem:[#allocation2 + $0x62] sm:$0xff]  ;;  %v1055_v51 = vld [vmem:[#allocation2 + $0x72] sm:$0xff]  ;;  %v1056_v52 = vld [vmem:[#allocation2 + $0x7a] sm:$0xff] }
  0x9d   :  { %3288 = vmatmul.mubr.msk.f32.gmra.mxu0 %vm45_vm0, %v144_v4  ;;  %v1057_v53 = vld [vmem:[#allocation2 + $0x82] sm:$0xff] }
  0x9e   :  { %3314 = vmatmul.mubr.msk.f32.gmra.mxu1 %vm45_vm0, %v376_v5  ;;  %3318 = vmatprep.mubr.msk.f32.mxu0 %vm45_vm0, %v588_v6 }
  0x9f   :  { %3344 = vmatprep.mubr.msk.f32.mxu1 %vm45_vm0, %v815_v7 }
  0xa1   :  { %3319 = vmatmul.mubr.msk.f32.vlgmr.msra.gmra.mxu0 %vm45_vm0, %v589_v8 }
  0xa2   :  { %3345 = vmatmul.mubr.msk.f32.vlgmr.msra.gmra.mxu1 %vm45_vm0, %v816_v9  ;;  %3369 = vmatpush3.msra.mxu0 %v3734_v35  ;;  %v829_v35 = vld [vmem:[#allocation2 + $0x79] sm:$0xff] }
  0xa3   :  { %3321 = vmatprep.mubr.msk.f32.mxu0 %vm45_vm0, %v590_v10  ;;  %3347 = vmatprep.mubr.msk.f32.mxu1 %vm45_vm0, %v817_v11 }
  0xa4   :  { %3395 = vmatpush3.msra.mxu1 %v1318_v54  ;;  %3420 = vmatprep.subr.mxu0 %v2959_v55 }
  0xa5   :  { %3322 = vmatmul.mubr.msk.f32.gmra.mxu0 %vm45_vm0, %v591_v12  ;;  %3446 = vmatprep.subr.mxu1 %v3831_v56 }
  0xa6   :  { %3348 = vmatmul.mubr.msk.f32.gmra.mxu1 %vm45_vm0, %v818_v13  ;;  %3324 = vmatprep.mubr.msk.f32.mxu0 %vm45_vm0, %v592_v14 }
  0xa7   :  { %3350 = vmatprep.mubr.msk.f32.mxu1 %vm45_vm0, %v819_v15 }
  0xa9   :  { %3325 = vmatmul.mubr.msk.f32.gmra.mxu0 %vm45_vm0, %v593_v16 }
  0xaa   :  { %3351 = vmatmul.mubr.msk.f32.gmra.mxu1 %vm45_vm0, %v820_v17  ;;  %3327 = vmatprep.mubr.msk.f32.mxu0 %vm45_vm0, %v594_v18 }
  0xab   :  { %3353 = vmatprep.mubr.msk.f32.mxu1 %vm45_vm0, %v821_v19 }
  0xad   :  { %3328 = vmatmul.mubr.msk.f32.gmra.mxu0 %vm45_vm0, %v595_v20 }
  0xae   :  { %3354 = vmatmul.mubr.msk.f32.gmra.mxu1 %vm45_vm0, %v822_v21  ;;  %3330 = vmatprep.mubr.msk.f32.mxu0 %vm45_vm0, %v596_v22 }
  0xaf   :  { %3356 = vmatprep.mubr.msk.f32.mxu1 %vm45_vm0, %v823_v23 }
  0xb1   :  { %3331 = vmatmul.mubr.msk.f32.gmra.mxu0 %vm45_vm0, %v597_v24 }
  0xb2   :  { %3357 = vmatmul.mubr.msk.f32.gmra.mxu1 %vm45_vm0, %v824_v25  ;;  %3333 = vmatprep.mubr.msk.f32.mxu0 %vm45_vm0, %v598_v26 }
  0xb3   :  { %3359 = vmatprep.mubr.msk.f32.mxu1 %vm45_vm0, %v825_v27 }
  0xb5   :  { %3334 = vmatmul.mubr.msk.f32.gmra.mxu0 %vm45_vm0, %v599_v28 }
  0xb6   :  { %3360 = vmatmul.mubr.msk.f32.gmra.mxu1 %vm45_vm0, %v826_v29  ;;  %3336 = vmatprep.mubr.msk.f32.mxu0 %vm45_vm0, %v600_v30 }
  0xb7   :  { %3362 = vmatprep.mubr.msk.f32.mxu1 %vm45_vm0, %v827_v31 }
  0xb9   :  { %3337 = vmatmul.mubr.msk.f32.gmra.mxu0 %vm45_vm0, %v601_v32 }
  0xba   :  { %3363 = vmatmul.mubr.msk.f32.gmra.mxu1 %vm45_vm0, %v828_v33  ;;  %3339 = vmatprep.mubr.msk.f32.mxu0 %vm45_vm0, %v602_v34 }
  0xbb   :  { %3365 = vmatprep.mubr.msk.f32.mxu1 %vm45_vm0, %v829_v35 }
  0xbd   :  { %3340 = vmatmul.mubr.msk.f32.gmra.mxu0 %vm45_vm0, %v603_v36 }
  0xbe   :  { %3366 = vmatmul.mubr.msk.f32.gmra.mxu1 %vm45_vm0, %v830_v37  ;;  %3370 = vmatprep.mubr.msk.f32.mxu0 %vm45_vm0, %v1042_v38 }
  0xc1   :  { %3371 = vmatmul.mubr.msk.f32.vlgmr.msra.gmra.mxu0 %vm45_vm0, %v1043_v39 }
  0xc2   :  { %3373 = vmatprep.mubr.msk.f32.mxu0 %vm45_vm0, %v1044_v40  ;;  %3421 = vmatpush3.msra.mxu0 %v2959_v55  ;;  %v3889_v40 = vld [vmem:[%s4334_s2] ss:$0 sm:$0xff] }
  0xc3   :  { %3472 = vmatprep.subr.mxu0 %v3837_v57 }
  0xc5   :  { %3374 = vmatmul.mubr.msk.f32.gmra.mxu0 %vm45_vm0, %v1045_v41 }
  0xc6   :  { %3376 = vmatprep.mubr.msk.f32.mxu0 %vm45_vm0, %v1046_v42 }
  0xc9   :  { %3377 = vmatmul.mubr.msk.f32.gmra.mxu0 %vm45_vm0, %v1047_v43 }
  0xca   :  { %3379 = vmatprep.mubr.msk.f32.mxu0 %vm45_vm0, %v1048_v44 }
  0xcd   :  { %3380 = vmatmul.mubr.msk.f32.gmra.mxu0 %vm45_vm0, %v1049_v45 }
  0xce   :  { %3382 = vmatprep.mubr.msk.f32.mxu0 %vm45_vm0, %v1050_v46 }
  0xd1   :  { %3383 = vmatmul.mubr.msk.f32.gmra.mxu0 %vm45_vm0, %v1051_v47 }
  0xd2   :  { %3385 = vmatprep.mubr.msk.f32.mxu0 %vm45_vm0, %v1052_v48 }
  0xd5   :  { %3386 = vmatmul.mubr.msk.f32.gmra.mxu0 %vm45_vm0, %v1053_v49 }
  0xd6   :  { %3388 = vmatprep.mubr.msk.f32.mxu0 %vm45_vm0, %v1054_v50 }
  0xd9   :  { %3389 = vmatmul.mubr.msk.f32.gmra.mxu0 %vm45_vm0, %v1055_v51 }
  0xda   :  { %3391 = vmatprep.mubr.msk.f32.mxu0 %vm45_vm0, %v1056_v52 }
  0xdd   :  { %3392 = vmatmul.mubr.msk.f32.gmra.mxu0 %vm45_vm0, %v1057_v53 }
 0x141   :  { %v3268_v58 = vpop.f32.mrf.mxu0 }
 0x142   :  { %v3294_v59 = vpop.f32.mrf.mxu1  ;;  %v346_v44 = vadd.f32 %v3268_v58, %v3889_v40 }
 0x143   :  { %v260_v60 = vpop.f32.mrf.mxu0 }
 0x144   :  { %v493_v61 = vpop.f32.mrf.mxu1  ;;  %v345_v46 = vadd.f32 %v3889_v40, %v260_v60  ;;  %v573_v49 = vadd.f32 %v3294_v59, %v346_v44 }
 0x145   :  { %v3271_v62 = vpop.f32.mrf.mxu0 }
 0x146   :  { %v3297_v63 = vpop.f32.mrf.mxu1  ;;  %v348_v50 = vadd.f32 %v3271_v62, %v3889_v40  ;;  %v572_v52 = vadd.f32 %v493_v61, %v345_v46 }
 0x147   :  { %v270_v0 = vpop.f32.mrf.mxu0 }
 0x148   :  { %v503_v1 = vpop.f32.mrf.mxu1  ;;  %v347_v53 = vadd.f32 %v3889_v40, %v270_v0  ;;  %v575_v58 = vadd.f32 %v3297_v63, %v348_v50 }
 0x149   :  { %v3274_v2 = vpop.f32.mrf.mxu0 }
 0x14a   :  { %v3840_v3 = vpop.f32.mrf.mxu1  ;;  %v574_v59 = vadd.f32 %v503_v1, %v347_v53 }
 0x14b   :  { %v280_v4 = vpop.f32.mrf.mxu0 }
 0x14c   :  { %v3842_v5 = vpop.f32.mrf.mxu1  ;;  %v349_v60 = vadd.f32 %v3889_v40, %v280_v4 }
 0x14d   :  { %v3277_v6 = vpop.f32.mrf.mxu0 }
 0x14e   :  { %v3844_v7 = vpop.f32.mrf.mxu1  ;;  %v576_v63 = vadd.f32 %v3842_v5, %v349_v60 }
 0x14f   :  { %v3846_v8 = vpop.f32.mrf.mxu0 }
 0x150   :  { %v3848_v9 = vpop.f32.mrf.mxu1 }
 0x151   :  { %v3850_v10 = vpop.f32.mrf.mxu0 }
 0x152   :  { %v3852_v11 = vpop.f32.mrf.mxu1 }
 0x153   :  { %v3854_v12 = vpop.f32.mrf.mxu0 }
 0x154   :  { %v3856_v13 = vpop.f32.mrf.mxu1 }
 0x155   :  { %v3858_v14 = vpop.f32.mrf.mxu0 }
 0x156   :  { %v3860_v15 = vpop.f32.mrf.mxu1 }
 0x157   :  { %v3862_v16 = vpop.f32.mrf.mxu0 }
 0x158   :  { %v3864_v17 = vpop.f32.mrf.mxu1 }
 0x159   :  { %v3866_v18 = vpop.f32.mrf.mxu0 }
 0x15a   :  { %v3868_v19 = vpop.f32.mrf.mxu1 }
 0x15b   :  { %v3870_v20 = vpop.f32.mrf.mxu0 }
 0x15c   :  { %v3872_v21 = vpop.f32.mrf.mxu1 }
 0x15d   :  { %4340 = vst [vmem:[#allocation3_spill] sm:$0xff] %v3872_v21  ;;  %v3874_v22 = vpop.f32.mrf.mxu0 }
 0x15e   :  { %v3876_v23 = vpop.f32.mrf.mxu1 }
 0x15f   :  { %4341 = vst [vmem:[#allocation4_spill] sm:$0xff] %v3876_v23  ;;  %v3878_v24 = vpop.f32.mrf.mxu0  ;;  %v350_v23 = vadd.f32 %v3274_v2, %v3889_v40  ;;  %v351_v2 = vadd.f32 %v3889_v40, %v3846_v8 }
 0x160   :  { %4342 = vst [vmem:[#allocation5_spill] sm:$0xff] %v3878_v24  ;;  %v3880_v25 = vpop.f32.mrf.mxu1 }
 0x161   :  { %4343 = vst [vmem:[#allocation6_spill] sm:$0xff] %v3880_v25  ;;  %v3320_v26 = vpop.f32.mrf.mxu0  ;;  %v577_v0 = vadd.f32 %v3840_v3, %v350_v23  ;;  %v578_v8 = vadd.f32 %v3848_v9, %v351_v2 }
 0x162   :  { %v3346_v27 = vpop.f32.mrf.mxu1  ;;  %v800_v54 = vadd.f32 %v3320_v26, %v573_v49 }
 0x163   :  { %v720_v28 = vpop.f32.mrf.mxu0 }
 0x164   :  { %v947_v29 = vpop.f32.mrf.mxu1  ;;  %v799_v24 = vadd.f32 %v720_v28, %v572_v52  ;;  %v1027_v44 = vadd.f32 %v3346_v27, %v800_v54 }
 0x165   :  { %v3323_v30 = vpop.f32.mrf.mxu0 }
 0x166   :  { %v3349_v32 = vpop.f32.mrf.mxu1  ;;  %v802_v62 = vadd.f32 %v3323_v30, %v575_v58  ;;  %v1026_v26 = vadd.f32 %v947_v29, %v799_v24 }
 0x167   :  { %v730_v31 = vpop.f32.mrf.mxu0 }
 0x168   :  { %v957_v35 = vpop.f32.mrf.mxu1  ;;  %v801_v49 = vadd.f32 %v730_v31, %v574_v59  ;;  %v1029_v28 = vadd.f32 %v3349_v32, %v802_v62  ;;  %v353_v31 = vadd.f32 %v3889_v40, %v3854_v12 }
 0x169   :  { %v3326_v33 = vpop.f32.mrf.mxu0 }
 0x16a   :  { %v3352_v38 = vpop.f32.mrf.mxu1  ;;  %v804_v50 = vadd.f32 %v3326_v33, %v577_v0  ;;  %v1028_v23 = vadd.f32 %v957_v35, %v801_v49 }
 0x16b   :  { %v740_v34 = vpop.f32.mrf.mxu0 }
 0x16c   :  { %v967_v42 = vpop.f32.mrf.mxu1  ;;  %v803_v24 = vadd.f32 %v740_v34, %v576_v63  ;;  %v1031_v32 = vadd.f32 %v3352_v38, %v804_v50  ;;  %v356_v34 = vadd.f32 %v3858_v14, %v3889_v40  ;;  %v355_v38 = vadd.f32 %v3889_v40, %v3862_v16 }
 0x16d   :  { %v3329_v36 = vpop.f32.mrf.mxu0 }
 0x16e   :  { %v3355_v47 = vpop.f32.mrf.mxu1  ;;  %v1030_v54 = vadd.f32 %v967_v42, %v803_v24  ;;  %v583_v42 = vadd.f32 %v3860_v15, %v356_v34 }
 0x16f   :  { %v3882_v37 = vpop.f32.mrf.mxu0 }
 0x170   :  { %v977_v55 = vpop.f32.mrf.mxu1  ;;  %v805_v9 = vadd.f32 %v3882_v37, %v578_v8  ;;  %v358_v37 = vadd.f32 %v3866_v18, %v3889_v40 }
 0x171   :  { %v3884_v39 = vpop.f32.mrf.mxu0 }
 0x172   :  { %v3358_v61 = vpop.f32.mrf.mxu1  ;;  %v1032_v0 = vadd.f32 %v977_v55, %v805_v9 }
 0x173   :  { %v3891_v41 = vpop.f32.mrf.mxu0 }
 0x174   :  { %v987_v52 = vpop.f32.mrf.mxu1 }
 0x175   :  { %v3893_v43 = vpop.f32.mrf.mxu0 }
 0x176   :  { %v3361_v35 = vpop.f32.mrf.mxu1  ;;  %v810_v18 = vadd.f32 %v3893_v43, %v583_v42 }
 0x177   :  { %v3896_v45 = vpop.f32.mrf.mxu0 }
 0x178   :  { %v997_v62 = vpop.f32.mrf.mxu1 }
 0x179   :  { %v3899_v48 = vpop.f32.mrf.mxu0 }
 0x17a   :  { %v3364_v43 = vpop.f32.mrf.mxu1 }
 0x17b   :  { %v3902_v51 = vpop.f32.mrf.mxu0 }
 0x17c   :  { %4344 = vst [vmem:[#allocation7_spill] sm:$0xff] %v3902_v51  ;;  %v352_v51 = vadd.f32 %v3277_v6, %v3889_v40  ;;  %v354_v6 = vadd.f32 %v3850_v10, %v3889_v40 }
 0x17d   :  { %v3905_v25 = vpop.f32.mrf.mxu0 }
 0x17e   :  { %4345 = vst [vmem:[#allocation8_spill] sm:$0xff] %v3905_v25  ;;  %v579_v30 = vadd.f32 %v3844_v7, %v352_v51  ;;  %v581_v51 = vadd.f32 %v3852_v11, %v354_v6 }
 0x17f   :  { %v3909_v21 = vpop.f32.mrf.mxu0 }
 0x180   :  { %v806_v33 = vadd.f32 %v3329_v36, %v579_v30  ;;  %v580_v36 = vadd.f32 %v3856_v13, %v353_v31  ;;  %v808_v11 = vadd.f32 %v3884_v39, %v581_v51  ;;  %v582_v39 = vadd.f32 %v3864_v17, %v355_v38  ;;  %v3949_v17 = vld [vmem:[%s4333_s3 + $0x20] sm:$0xff] }
 0x181   :  { %v3372_v46 = vpop.f32.mrf.mxu0 }
 0x182   :  { %v1254_v25 = vadd.f32 %v3372_v46, %v1027_v44  ;;  %v1033_v59 = vadd.f32 %v3355_v47, %v806_v33  ;;  %v807_v13 = vadd.f32 %v3891_v41, %v580_v36 }
 0x183   :  { %v1174_v4 = vpop.f32.mrf.mxu0 }
 0x184   :  { %v1270_v1 = vmax.f32 %v1254_v25, 0.0  ;;  %v1253_v27 = vadd.f32 %v1174_v4, %v1026_v26  ;;  %v357_v26 = vadd.f32 %v3889_v40, %v3870_v20  ;;  %v1035_v4 = vadd.f32 %v3358_v61, %v808_v11 }
 0x185   :  { %v3375_v3 = vpop.f32.mrf.mxu0  ;;  %v585_v20 = vadd.f32 %v3868_v19, %v358_v37  ;;  %v360_v61 = vadd.f32 %v3874_v22, %v3889_v40  ;;  %v4346_v19 = vld [vmem:[#allocation3_spill] sm:$0xff]  ;;  %v4347_v22 = vld [vmem:[#allocation5_spill] sm:$0xff]  ;;  %v4351_v38 = vld [vmem:[#allocation8_spill] sm:$0xff] }
 0x186   :  { %1286 = vst.msk [vmem:[#allocation2 + $0x10] sm:$0xff] %vm45_vm0, %v1270_v1  ;;  %v1269_v5 = vmax.f32 %v1253_v27, 0.0  ;;  %v1256_v29 = vadd.f32 %v3375_v3, %v1029_v28  ;;  %v1034_v1 = vadd.f32 %v987_v52, %v807_v13  ;;  %v809_v27 = vadd.f32 %v3896_v45, %v582_v39 }
 0x187   :  { %v1184_v25 = vpop.f32.mrf.mxu0  ;;  %v584_v3 = vadd.f32 %v4346_v19, %v357_v26  ;;  %v1037_v45 = vadd.f32 %v3361_v35, %v810_v18  ;;  %v812_v52 = vadd.f32 %v3899_v48, %v585_v20  ;;  %v4350_v35 = vld [vmem:[#allocation6_spill] sm:$0xff] }
 0x188   :  { %1285 = vst.msk [vmem:[#allocation2 + $0x8] sm:$0xff] %vm45_vm0, %v1269_v5  ;;  %v1272_v7 = vmax.f32 %v1256_v29, 0.0  ;;  %v1255_v10 = vadd.f32 %v1184_v25, %v1028_v23  ;;  %v359_v23 = vadd.f32 %v3889_v40, %v4347_v22  ;;  %v4348_v25 = vld [vmem:[#allocation4_spill] sm:$0xff] }
 0x189   :  { %v3378_v53 = vpop.f32.mrf.mxu0  ;;  %v587_v40 = vadd.f32 %v4348_v25, %v360_v61  ;;  %v1039_v36 = vadd.f32 %v3364_v43, %v812_v52 }
 0x18a   :  { %1288 = vst.msk [vmem:[#allocation2 + $0x20] sm:$0xff] %vm45_vm0, %v1272_v7  ;;  %v1271_v12 = vmax.f32 %v1255_v10, 0.0  ;;  %v1258_v58 = vadd.f32 %v3378_v53, %v1031_v32  ;;  %v1007_v32 = vpop.f32.mrf.mxu1  ;;  %v1036_v7 = vadd.f32 %v997_v62, %v809_v27  ;;  %v4349_v10 = vld [vmem:[#allocation7_spill] sm:$0xff]  ;;  %v586_v53 = vadd.f32 %v4350_v35, %v359_v23 }
 0x18b   :  { %v1194_v60 = vpop.f32.mrf.mxu0  ;;  %v811_v48 = vadd.f32 %v4349_v10, %v584_v3 }
 0x18c   :  { %1287 = vst.msk [vmem:[#allocation2 + $0x18] sm:$0xff] %vm45_vm0, %v1271_v12  ;;  %v1274_v14 = vmax.f32 %v1258_v58, 0.0  ;;  %v1257_v44 = vadd.f32 %v1194_v60, %v1030_v54  ;;  %v814_v60 = vadd.f32 %v4351_v38, %v587_v40  ;;  %v813_v62 = vadd.f32 %v3909_v21, %v586_v53 }
 0x18d   :  { %v3381_v46 = vpop.f32.mrf.mxu0  ;;  %v1038_v37 = vadd.f32 %v1007_v32, %v811_v48 }
 0x18e   :  { %1290 = vst.msk [vmem:[#allocation2 + $0x30] sm:$0xff] %vm45_vm0, %v1274_v14  ;;  %v1273_v16 = vmax.f32 %v1257_v44, 0.0  ;;  %v1260_v47 = vadd.f32 %v3381_v46, %v1033_v59  ;;  %v3367_v44 = vpop.f32.mrf.mxu1 }
 0x18f   :  { %v1204_v49 = vpop.f32.mrf.mxu0  ;;  %v1302_v63 = vld [vmem:[#allocation2 + $0x6] sm:$0xff]  ;;  %v1303_v2 = vld [vmem:[#allocation2 + $0xe] sm:$0xff]  ;;  %v1041_v26 = vadd.f32 %v3367_v44, %v814_v60 }
 0x190   :  { %v1534_v15 = vld [vmem:[#allocation2 + $0x7] sm:$0xff]  ;;  %1289 = vst.msk [vmem:[#allocation2 + $0x28] sm:$0xff] %vm45_vm0, %v1273_v16  ;;  %v1276_v55 = vmax.f32 %v1260_v47, 0.0  ;;  %v1259_v41 = vadd.f32 %v1204_v49, %v1032_v0  ;;  %3396 = vmatprep.mubr.msk.f32.mxu1 %vm45_vm0, %v1302_v63  ;;  %v1535_v28 = vld [vmem:[#allocation2 + $0xf] sm:$0xff] }
 0x191   :  { %3422 = vmatprep.mubr.msk.f32.mxu0 %vm45_vm0, %v1534_v15  ;;  %v3384_v50 = vpop.f32.mrf.mxu0  ;;  %3397 = vmatmul.mubr.msk.f32.vlgmr.msra.gmra.mxu1 %vm45_vm0, %v1303_v2  ;;  %v1017_v2 = vpop.f32.mrf.mxu1 }
 0x192   :  { %3423 = vmatmul.mubr.msk.f32.vlgmr.msra.gmra.mxu0 %vm45_vm0, %v1535_v28  ;;  %1292 = vst.msk [vmem:[#allocation2 + $0x40] sm:$0xff] %vm45_vm0, %v1276_v55  ;;  %v1275_v30 = vmax.f32 %v1259_v41, 0.0  ;;  %v1262_v6 = vadd.f32 %v3384_v50, %v1035_v4  ;;  %3447 = vmatpush3.msra.mxu1 %v3831_v56  ;;  %v1040_v4 = vadd.f32 %v1017_v2, %v813_v62 }
 0x193   :  { %3473 = vmatpush3.msra.mxu0 %v3837_v57  ;;  %v1214_v24 = vpop.f32.mrf.mxu0  ;;  %v1304_v5 = vld [vmem:[#allocation2 + $0x16] sm:$0xff]  ;;  %v1305_v8 = vld [vmem:[#allocation2 + $0x1e] sm:$0xff]  ;;  %3498 = vmatprep.subr.mxu1 %v3949_v17 }
 0x194   :  { %v1536_v29 = vld [vmem:[#allocation2 + $0x17] sm:$0xff]  ;;  %1291 = vst.msk [vmem:[#allocation2 + $0x38] sm:$0xff] %vm45_vm0, %v1275_v30  ;;  %v1278_v31 = vmax.f32 %v1262_v6, 0.0  ;;  %v1261_v56 = vadd.f32 %v1214_v24, %v1034_v1  ;;  %3399 = vmatprep.mubr.msk.f32.mxu1 %vm45_vm0, %v1304_v5  ;;  %v1537_v57 = vld [vmem:[#allocation2 + $0x1f] sm:$0xff] }
 0x195   :  { %3425 = vmatprep.mubr.msk.f32.mxu0 %vm45_vm0, %v1536_v29  ;;  %v3387_v33 = vpop.f32.mrf.mxu0  ;;  %3400 = vmatmul.mubr.msk.f32.gmra.mxu1 %vm45_vm0, %v1305_v8  ;;  %v1989_v25 = vld [vmem:[#allocation2 + $0x11] sm:$0xff]  ;;  %v1990_v32 = vld [vmem:[#allocation2 + $0x19] sm:$0xff] }
 0x196   :  { %3426 = vmatmul.mubr.msk.f32.gmra.mxu0 %vm45_vm0, %v1537_v57  ;;  %1294 = vst.msk [vmem:[#allocation2 + $0x50] sm:$0xff] %vm45_vm0, %v1278_v31  ;;  %v1277_v51 = vmax.f32 %v1261_v56, 0.0  ;;  %v1264_v34 = vadd.f32 %v3387_v33, %v1037_v45  ;;  %v1761_v31 = vld [vmem:[#allocation2 + $0x8] sm:$0xff]  ;;  %v1762_v57 = vld [vmem:[#allocation2 + $0x10] sm:$0xff]  ;;  %v1763_v40 = vld [vmem:[#allocation2 + $0x18] sm:$0xff] }
 0x197   :  { %v1224_v54 = vpop.f32.mrf.mxu0  ;;  %v1306_v9 = vld [vmem:[#allocation2 + $0x26] sm:$0xff]  ;;  %v1307_v58 = vld [vmem:[#allocation2 + $0x2e] sm:$0xff] }
 0x198   :  { %v1538_v12 = vld [vmem:[#allocation2 + $0x27] sm:$0xff]  ;;  %1293 = vst.msk [vmem:[#allocation2 + $0x48] sm:$0xff] %vm45_vm0, %v1277_v51  ;;  %v1280_v59 = vmax.f32 %v1264_v34, 0.0  ;;  %v1263_v11 = vadd.f32 %v1224_v54, %v1036_v7  ;;  %3402 = vmatprep.mubr.msk.f32.mxu1 %vm45_vm0, %v1306_v9  ;;  %v1539_v14 = vld [vmem:[#allocation2 + $0x2f] sm:$0xff] }
 0x199   :  { %3428 = vmatprep.mubr.msk.f32.mxu0 %vm45_vm0, %v1538_v12  ;;  %v3390_v42 = vpop.f32.mrf.mxu0  ;;  %3403 = vmatmul.mubr.msk.f32.gmra.mxu1 %vm45_vm0, %v1307_v58  ;;  %v1988_v56 = vld [vmem:[#allocation2 + $0x9] sm:$0xff]  ;;  %v1764_v33 = vld [vmem:[#allocation2 + $0x20] sm:$0xff] }
 0x19a   :  { %3429 = vmatmul.mubr.msk.f32.gmra.mxu0 %vm45_vm0, %v1539_v14  ;;  %1296 = vst.msk [vmem:[#allocation2 + $0x60] sm:$0xff] %vm45_vm0, %v1280_v59  ;;  %v1279_v46 = vmax.f32 %v1263_v11, 0.0  ;;  %v1266_v0 = vadd.f32 %v3390_v42, %v1039_v36  ;;  %v1991_v7 = vld [vmem:[#allocation2 + $0x21] sm:$0xff]  ;;  %v1992_v48 = vld [vmem:[#allocation2 + $0x29] sm:$0xff] }
 0x19b   :  { %v1234_v13 = vpop.f32.mrf.mxu0  ;;  %v1308_v16 = vld [vmem:[#allocation2 + $0x36] sm:$0xff]  ;;  %v1309_v39 = vld [vmem:[#allocation2 + $0x3e] sm:$0xff]  ;;  %v1765_v10 = vld [vmem:[#allocation2 + $0x28] sm:$0xff] }
 0x19c   :  { %v1540_v47 = vld [vmem:[#allocation2 + $0x37] sm:$0xff]  ;;  %1295 = vst.msk [vmem:[#allocation2 + $0x58] sm:$0xff] %vm45_vm0, %v1279_v46  ;;  %v1282_v49 = vmax.f32 %v1266_v0, 0.0  ;;  %v1265_v63 = vadd.f32 %v1234_v13, %v1038_v37  ;;  %3405 = vmatprep.mubr.msk.f32.mxu1 %vm45_vm0, %v1308_v16  ;;  %v1541_v15 = vld [vmem:[#allocation2 + $0x3f] sm:$0xff]  ;;  %v2215_v16 = vld [vmem:[#allocation2 + $0xa] sm:$0xff] }
 0x19d   :  { %3431 = vmatprep.mubr.msk.f32.mxu0 %vm45_vm0, %v1540_v47  ;;  %v3393_v21 = vpop.f32.mrf.mxu0  ;;  %3406 = vmatmul.mubr.msk.f32.gmra.mxu1 %vm45_vm0, %v1309_v39  ;;  %v1766_v51 = vld [vmem:[#allocation2 + $0x30] sm:$0xff]  ;;  %v1994_v35 = vld [vmem:[#allocation2 + $0x39] sm:$0xff] }
 0x19e   :  { %3432 = vmatmul.mubr.msk.f32.gmra.mxu0 %vm45_vm0, %v1541_v15  ;;  %1298 = vst.msk [vmem:[#allocation2 + $0x70] sm:$0xff] %vm45_vm0, %v1282_v49  ;;  %v1281_v18 = vmax.f32 %v1265_v63, 0.0  ;;  %v1268_v55 = vadd.f32 %v3393_v21, %v1041_v26  ;;  %v1993_v34 = vld [vmem:[#allocation2 + $0x31] sm:$0xff]  ;;  %v1768_v53 = vld [vmem:[#allocation2 + $0x40] sm:$0xff] }
 0x19f   :  { %v1244_v41 = vpop.f32.mrf.mxu0  ;;  %v1310_v28 = vld [vmem:[#allocation2 + $0x46] sm:$0xff]  ;;  %v1311_v61 = vld [vmem:[#allocation2 + $0x4e] sm:$0xff]  ;;  %v2217_v39 = vld [vmem:[#allocation2 + $0x1a] sm:$0xff] }
 0x1a0   :  { %v1542_v20 = vld [vmem:[#allocation2 + $0x47] sm:$0xff]  ;;  %1297 = vst.msk [vmem:[#allocation2 + $0x68] sm:$0xff] %vm45_vm0, %v1281_v18  ;;  %v1284_v43 = vmax.f32 %v1268_v55, 0.0  ;;  %v1267_v50 = vadd.f32 %v1244_v41, %v1040_v4  ;;  %3408 = vmatprep.mubr.msk.f32.mxu1 %vm45_vm0, %v1310_v28  ;;  %v1543_v1 = vld [vmem:[#allocation2 + $0x4f] sm:$0xff]  ;;  %v2221_v15 = vld [vmem:[#allocation2 + $0x3a] sm:$0xff] }
 0x1a1   :  { %3434 = vmatprep.mubr.msk.f32.mxu0 %vm45_vm0, %v1542_v20  ;;  %3409 = vmatmul.mubr.msk.f32.gmra.mxu1 %vm45_vm0, %v1311_v61  ;;  %v1995_v54 = vld [vmem:[#allocation2 + $0x41] sm:$0xff]  ;;  %v1996_v12 = vld [vmem:[#allocation2 + $0x49] sm:$0xff]  ;;  %v2216_v47 = vld [vmem:[#allocation2 + $0x12] sm:$0xff] }
 0x1a2   :  { %3435 = vmatmul.mubr.msk.f32.gmra.mxu0 %vm45_vm0, %v1543_v1  ;;  %1300 = vst.msk [vmem:[#allocation2 + $0x80] sm:$0xff] %vm45_vm0, %v1284_v43  ;;  %v1283_v27 = vmax.f32 %v1267_v50, 0.0  ;;  %v1769_v9 = vld [vmem:[#allocation2 + $0x48] sm:$0xff]  ;;  %v1770_v58 = vld [vmem:[#allocation2 + $0x50] sm:$0xff]  ;;  %v1772_v59 = vld [vmem:[#allocation2 + $0x60] sm:$0xff] }
 0x1a3   :  { %v1312_v30 = vld [vmem:[#allocation2 + $0x56] sm:$0xff]  ;;  %v1313_v19 = vld [vmem:[#allocation2 + $0x5e] sm:$0xff]  ;;  %v2219_v49 = vld [vmem:[#allocation2 + $0x2a] sm:$0xff] }
 0x1a4   :  { %v1544_v6 = vld [vmem:[#allocation2 + $0x57] sm:$0xff]  ;;  %1299 = vst.msk [vmem:[#allocation2 + $0x78] sm:$0xff] %vm45_vm0, %v1283_v27  ;;  %3411 = vmatprep.mubr.msk.f32.mxu1 %vm45_vm0, %v1312_v30  ;;  %v1545_v3 = vld [vmem:[#allocation2 + $0x5f] sm:$0xff]  ;;  %v2223_v21 = vld [vmem:[#allocation2 + $0x4a] sm:$0xff] }
 0x1a5   :  { %3437 = vmatprep.mubr.msk.f32.mxu0 %vm45_vm0, %v1544_v6  ;;  %3412 = vmatmul.mubr.msk.f32.gmra.mxu1 %vm45_vm0, %v1313_v19  ;;  %v1997_v36 = vld [vmem:[#allocation2 + $0x51] sm:$0xff]  ;;  %v1998_v60 = vld [vmem:[#allocation2 + $0x59] sm:$0xff]  ;;  %v2218_v26 = vld [vmem:[#allocation2 + $0x22] sm:$0xff] }
 0x1a6   :  { %3438 = vmatmul.mubr.msk.f32.gmra.mxu0 %vm45_vm0, %v1545_v3  ;;  %v1771_v38 = vld [vmem:[#allocation2 + $0x58] sm:$0xff]  ;;  %v1774_v42 = vld [vmem:[#allocation2 + $0x70] sm:$0xff]  ;;  %v2222_v2 = vld [vmem:[#allocation2 + $0x42] sm:$0xff] }
 0x1a7   :  { %v1314_v22 = vld [vmem:[#allocation2 + $0x66] sm:$0xff]  ;;  %v1315_v24 = vld [vmem:[#allocation2 + $0x6e] sm:$0xff]  ;;  %v2225_v18 = vld [vmem:[#allocation2 + $0x5a] sm:$0xff] }
 0x1a8   :  { %v1546_v23 = vld [vmem:[#allocation2 + $0x67] sm:$0xff]  ;;  %3414 = vmatprep.mubr.msk.f32.mxu1 %vm45_vm0, %v1314_v22  ;;  %v1547_v5 = vld [vmem:[#allocation2 + $0x6f] sm:$0xff]  ;;  %v3581_v6 = vld [vmem:[%s4331_s0 + $0x18] sm:$0xff] }
 0x1a9   :  { %3440 = vmatprep.mubr.msk.f32.mxu0 %vm45_vm0, %v1546_v23  ;;  %3415 = vmatmul.mubr.msk.f32.gmra.mxu1 %vm45_vm0, %v1315_v24  ;;  %v1999_v11 = vld [vmem:[#allocation2 + $0x61] sm:$0xff]  ;;  %v2000_v44 = vld [vmem:[#allocation2 + $0x69] sm:$0xff]  ;;  %v2220_v63 = vld [vmem:[#allocation2 + $0x32] sm:$0xff] }
 0x1aa   :  { %3441 = vmatmul.mubr.msk.f32.gmra.mxu0 %vm45_vm0, %v1547_v5  ;;  %v1773_v14 = vld [vmem:[#allocation2 + $0x68] sm:$0xff]  ;;  %v1776_v0 = vld [vmem:[#allocation2 + $0x80] sm:$0xff]  ;;  %v2224_v4 = vld [vmem:[#allocation2 + $0x52] sm:$0xff] }
 0x1ab   :  { %v1316_v29 = vld [vmem:[#allocation2 + $0x76] sm:$0xff]  ;;  %v1317_v45 = vld [vmem:[#allocation2 + $0x7e] sm:$0xff]  ;;  %v2227_v41 = vld [vmem:[#allocation2 + $0x6a] sm:$0xff] }
 0x1ac   :  { %v1548_v8 = vld [vmem:[#allocation2 + $0x77] sm:$0xff]  ;;  %3417 = vmatprep.mubr.msk.f32.mxu1 %vm45_vm0, %v1316_v29  ;;  %v1549_v52 = vld [vmem:[#allocation2 + $0x7f] sm:$0xff]  ;;  %v3579_v27 = vld [vmem:[%s4331_s0 + $0x8] sm:$0xff] }
 0x1ad   :  { %3443 = vmatprep.mubr.msk.f32.mxu0 %vm45_vm0, %v1548_v8  ;;  %3418 = vmatmul.mubr.msk.f32.gmra.mxu1 %vm45_vm0, %v1317_v45  ;;  %v2001_v37 = vld [vmem:[#allocation2 + $0x71] sm:$0xff]  ;;  %v2002_v46 = vld [vmem:[#allocation2 + $0x79] sm:$0xff]  ;;  %v2003_v13 = vld [vmem:[#allocation2 + $0x81] sm:$0xff] }
 0x1ae   :  { %3444 = vmatmul.mubr.msk.f32.gmra.mxu0 %vm45_vm0, %v1549_v52  ;;  %3448 = vmatprep.mubr.msk.f32.mxu1 %vm45_vm0, %v1761_v31  ;;  %v1775_v62 = vld [vmem:[#allocation2 + $0x78] sm:$0xff]  ;;  %v2226_v55 = vld [vmem:[#allocation2 + $0x62] sm:$0xff]  ;;  %v3580_v30 = vld [vmem:[%s4331_s0 + $0x10] sm:$0xff] }
 0x1af   :  { %3474 = vmatprep.mubr.msk.f32.mxu0 %vm45_vm0, %v1988_v56  ;;  %v2228_v28 = vld [vmem:[#allocation2 + $0x72] sm:$0xff]  ;;  %v2229_v20 = vld [vmem:[#allocation2 + $0x7a] sm:$0xff]  ;;  %v2230_v61 = vld [vmem:[#allocation2 + $0x82] sm:$0xff] }
 0x1b0   :  { %v3578_v43 = vld [vmem:[%s4331_s0] sm:$0xff]  ;;  %v3583_v3 = vld [vmem:[%s4331_s0 + $0x28] sm:$0xff]  ;;  %v3584_v22 = vld [vmem:[%s4331_s0 + $0x30] sm:$0xff] }
 0x1b1   :  { %3449 = vmatmul.mubr.msk.f32.vlgmr.msra.gmra.mxu1 %vm45_vm0, %v1762_v57  ;;  %v2443_v50 = vld [vmem:[%s4335_s6] sm:$0xff]  ;;  %v3585_v23 = vld [vmem:[%s4331_s0 + $0x38] sm:$0xff]  ;;  %v3587_v5 = vld [vmem:[%s4331_s0 + $0x48] sm:$0xff] }
 0x1b2   :  { %3475 = vmatmul.mubr.msk.f32.vlgmr.msra.gmra.mxu0 %vm45_vm0, %v1989_v25  ;;  %3499 = vmatpush3.msra.mxu1 %v3949_v17  ;;  %v1767_v17 = vld [vmem:[#allocation2 + $0x38] sm:$0xff]  ;;  %v2442_v1 = vld [vmem:[%s4336_s5] sm:$0xff]  ;;  %v3588_v29 = vld [vmem:[%s4331_s0 + $0x50] sm:$0xff] }
 0x1b3   :  { %3451 = vmatprep.mubr.msk.f32.mxu1 %vm45_vm0, %v1763_v40  ;;  %3477 = vmatprep.mubr.msk.f32.mxu0 %vm45_vm0, %v1990_v32  ;;  %v3582_v19 = vld [vmem:[%s4331_s0 + $0x20] sm:$0xff]  ;;  %v3589_v8 = vld [vmem:[%s4331_s0 + $0x58] sm:$0xff]  ;;  %v3591_v52 = vld [vmem:[%s4331_s0 + $0x68] sm:$0xff] }
 0x1b4   :  { %3524 = vmatprep.subr.mxu0 %v2443_v50  ;;  %3550 = vmatprep.subr.mxu1 %v2442_v1  ;;  %v3586_v24 = vld [vmem:[%s4331_s0 + $0x40] sm:$0xff]  ;;  %v3592_v31 = vld [vmem:[%s4331_s0 + $0x70] sm:$0xff]  ;;  %v3593_v56 = vld [vmem:[%s4331_s0 + $0x78] sm:$0xff] }
 0x1b5   :  { %3452 = vmatmul.mubr.msk.f32.gmra.mxu1 %vm45_vm0, %v1764_v33  ;;  %3525 = vmatpush3.msra.mxu0 %v2443_v50  ;;  %v3590_v45 = vld [vmem:[%s4331_s0 + $0x60] sm:$0xff] }
 0x1b6   :  { %3478 = vmatmul.mubr.msk.f32.gmra.mxu0 %vm45_vm0, %v1991_v7  ;;  %3454 = vmatprep.mubr.msk.f32.mxu1 %vm45_vm0, %v1765_v10 }
 0x1b7   :  { %3480 = vmatprep.mubr.msk.f32.mxu0 %vm45_vm0, %v1992_v48 }
 0x1b9   :  { %3455 = vmatmul.mubr.msk.f32.gmra.mxu1 %vm45_vm0, %v1766_v51 }
 0x1ba   :  { %3481 = vmatmul.mubr.msk.f32.gmra.mxu0 %vm45_vm0, %v1993_v34  ;;  %3457 = vmatprep.mubr.msk.f32.mxu1 %vm45_vm0, %v1767_v17 }
 0x1bb   :  { %3483 = vmatprep.mubr.msk.f32.mxu0 %vm45_vm0, %v1994_v35 }
 0x1bd   :  { %3458 = vmatmul.mubr.msk.f32.gmra.mxu1 %vm45_vm0, %v1768_v53 }
 0x1be   :  { %3484 = vmatmul.mubr.msk.f32.gmra.mxu0 %vm45_vm0, %v1995_v54  ;;  %3460 = vmatprep.mubr.msk.f32.mxu1 %vm45_vm0, %v1769_v9 }
 0x1bf   :  { %3486 = vmatprep.mubr.msk.f32.mxu0 %vm45_vm0, %v1996_v12 }
 0x1c1   :  { %3461 = vmatmul.mubr.msk.f32.gmra.mxu1 %vm45_vm0, %v1770_v58 }
 0x1c2   :  { %3487 = vmatmul.mubr.msk.f32.gmra.mxu0 %vm45_vm0, %v1997_v36  ;;  %3463 = vmatprep.mubr.msk.f32.mxu1 %vm45_vm0, %v1771_v38 }
 0x1c3   :  { %3489 = vmatprep.mubr.msk.f32.mxu0 %vm45_vm0, %v1998_v60 }
 0x1c5   :  { %3464 = vmatmul.mubr.msk.f32.gmra.mxu1 %vm45_vm0, %v1772_v59 }
 0x1c6   :  { %3490 = vmatmul.mubr.msk.f32.gmra.mxu0 %vm45_vm0, %v1999_v11  ;;  %3466 = vmatprep.mubr.msk.f32.mxu1 %vm45_vm0, %v1773_v14 }
 0x1c7   :  { %3492 = vmatprep.mubr.msk.f32.mxu0 %vm45_vm0, %v2000_v44 }
 0x1c9   :  { %3467 = vmatmul.mubr.msk.f32.gmra.mxu1 %vm45_vm0, %v1774_v42 }
 0x1ca   :  { %3493 = vmatmul.mubr.msk.f32.gmra.mxu0 %vm45_vm0, %v2001_v37  ;;  %3469 = vmatprep.mubr.msk.f32.mxu1 %vm45_vm0, %v1775_v62 }
 0x1cb   :  { %3495 = vmatprep.mubr.msk.f32.mxu0 %vm45_vm0, %v2002_v46 }
 0x1cd   :  { %3470 = vmatmul.mubr.msk.f32.gmra.mxu1 %vm45_vm0, %v1776_v0 }
 0x1ce   :  { %3496 = vmatmul.mubr.msk.f32.gmra.mxu0 %vm45_vm0, %v2003_v13  ;;  %3500 = vmatprep.mubr.msk.f32.mxu1 %vm45_vm0, %v2215_v16 }
 0x1d1   :  { %3501 = vmatmul.mubr.msk.f32.vlgmr.msra.gmra.mxu1 %vm45_vm0, %v2216_v47 }
 0x1d2   :  { %3503 = vmatprep.mubr.msk.f32.mxu1 %vm45_vm0, %v2217_v39  ;;  %3551 = vmatpush3.msra.mxu1 %v2442_v1 }
 0x1d5   :  { %3504 = vmatmul.mubr.msk.f32.gmra.mxu1 %vm45_vm0, %v2218_v26 }
 0x1d6   :  { %3506 = vmatprep.mubr.msk.f32.mxu1 %vm45_vm0, %v2219_v49 }
 0x1d9   :  { %3507 = vmatmul.mubr.msk.f32.gmra.mxu1 %vm45_vm0, %v2220_v63 }
 0x1da   :  { %3509 = vmatprep.mubr.msk.f32.mxu1 %vm45_vm0, %v2221_v15 }
 0x1dd   :  { %3510 = vmatmul.mubr.msk.f32.gmra.mxu1 %vm45_vm0, %v2222_v2 }
 0x1de   :  { %3512 = vmatprep.mubr.msk.f32.mxu1 %vm45_vm0, %v2223_v21 }
 0x1e1   :  { %3513 = vmatmul.mubr.msk.f32.gmra.mxu1 %vm45_vm0, %v2224_v4 }
 0x1e2   :  { %3515 = vmatprep.mubr.msk.f32.mxu1 %vm45_vm0, %v2225_v18 }
 0x1e5   :  { %3516 = vmatmul.mubr.msk.f32.gmra.mxu1 %vm45_vm0, %v2226_v55 }
 0x1e6   :  { %3518 = vmatprep.mubr.msk.f32.mxu1 %vm45_vm0, %v2227_v41 }
 0x1e9   :  { %3519 = vmatmul.mubr.msk.f32.gmra.mxu1 %vm45_vm0, %v2228_v28 }
 0x1ea   :  { %3521 = vmatprep.mubr.msk.f32.mxu1 %vm45_vm0, %v2229_v20 }
 0x1ed   :  { %3522 = vmatmul.mubr.msk.f32.gmra.mxu1 %vm45_vm0, %v2230_v61 }
 0x1ee   :  { %3552 = vmatprep.mubr.msk.f32.mxu1 %vm45_vm0, %v3578_v43 }
 0x1f1   :  { %3553 = vmatmul.mubr.msk.f32.vlgmr.msra.gmra.mxu1 %vm45_vm0, %v3579_v27  ;;  %v4181_v27 = vld [vmem:[%s4337_s4] ss:$0 sm:$0xff] }
 0x1f2   :  { %3555 = vmatprep.mubr.msk.f32.mxu1 %vm45_vm0, %v3580_v30 }
 0x1f5   :  { %3556 = vmatmul.mubr.msk.f32.gmra.mxu1 %vm45_vm0, %v3581_v6 }
 0x1f6   :  { %3558 = vmatprep.mubr.msk.f32.mxu1 %vm45_vm0, %v3582_v19 }
 0x1f9   :  { %3559 = vmatmul.mubr.msk.f32.gmra.mxu1 %vm45_vm0, %v3583_v3 }
 0x1fa   :  { %3561 = vmatprep.mubr.msk.f32.mxu1 %vm45_vm0, %v3584_v22 }
 0x1fd   :  { %3562 = vmatmul.mubr.msk.f32.gmra.mxu1 %vm45_vm0, %v3585_v23 }
 0x1fe   :  { %3564 = vmatprep.mubr.msk.f32.mxu1 %vm45_vm0, %v3586_v24 }
 0x201   :  { %3565 = vmatmul.mubr.msk.f32.gmra.mxu1 %vm45_vm0, %v3587_v5 }
 0x202   :  { %3567 = vmatprep.mubr.msk.f32.mxu1 %vm45_vm0, %v3588_v29 }
 0x205   :  { %3568 = vmatmul.mubr.msk.f32.gmra.mxu1 %vm45_vm0, %v3589_v8 }
 0x206   :  { %3570 = vmatprep.mubr.msk.f32.mxu1 %vm45_vm0, %v3590_v45 }
 0x209   :  { %3571 = vmatmul.mubr.msk.f32.gmra.mxu1 %vm45_vm0, %v3591_v52 }
 0x20a   :  { %3573 = vmatprep.mubr.msk.f32.mxu1 %vm45_vm0, %v3592_v31 }
 0x20d   :  { %3574 = vmatmul.mubr.msk.f32.gmra.mxu1 %vm45_vm0, %v3593_v56 }
 0x251   :  { %v3398_v57 = vpop.f32.mrf.mxu1 }
 0x252   :  { %v3424_v25 = vpop.f32.mrf.mxu0  ;;  %v1519_v19 = vadd.f32 %v3398_v57, %v4181_v27 }
 0x253   :  { %v1433_v40 = vpop.f32.mrf.mxu1 }
 0x254   :  { %v1666_v32 = vpop.f32.mrf.mxu0  ;;  %v1518_v6 = vadd.f32 %v4181_v27, %v1433_v40  ;;  %v1746_v29 = vadd.f32 %v3424_v25, %v1519_v19 }
 0x255   :  { %v3401_v33 = vpop.f32.mrf.mxu1 }
 0x256   :  { %v4126_v7 = vpop.f32.mrf.mxu0  ;;  %v1745_v24 = vadd.f32 %v1666_v32, %v1518_v6  ;;  %v1521_v8 = vadd.f32 %v3401_v33, %v4181_v27 }
 0x257   :  { %v1443_v10 = vpop.f32.mrf.mxu1 }
 0x258   :  { %v1676_v48 = vpop.f32.mrf.mxu0  ;;  %v1520_v5 = vadd.f32 %v4181_v27, %v1443_v10 }
 0x259   :  { %v3404_v51 = vpop.f32.mrf.mxu1 }
 0x25a   :  { %v4128_v34 = vpop.f32.mrf.mxu0  ;;  %v1747_v57 = vadd.f32 %v1676_v48, %v1520_v5 }
 0x25b   :  { %v1453_v17 = vpop.f32.mrf.mxu1 }
 0x25c   :  { %v4130_v35 = vpop.f32.mrf.mxu0 }
 0x25d   :  { %v4132_v53 = vpop.f32.mrf.mxu1 }
 0x25e   :  { %v4134_v54 = vpop.f32.mrf.mxu0 }
 0x25f   :  { %v4136_v9 = vpop.f32.mrf.mxu1 }
 0x260   :  { %v4138_v12 = vpop.f32.mrf.mxu0 }
 0x261   :  { %v4140_v58 = vpop.f32.mrf.mxu1 }
 0x262   :  { %v4142_v36 = vpop.f32.mrf.mxu0 }
 0x263   :  { %v4144_v38 = vpop.f32.mrf.mxu1 }
 0x264   :  { %v4146_v60 = vpop.f32.mrf.mxu0 }
 0x265   :  { %v4148_v59 = vpop.f32.mrf.mxu1 }
 0x266   :  { %v4150_v11 = vpop.f32.mrf.mxu0 }
 0x267   :  { %v4152_v14 = vpop.f32.mrf.mxu1 }
 0x268   :  { %v4154_v44 = vpop.f32.mrf.mxu0 }
 0x269   :  { %v4156_v42 = vpop.f32.mrf.mxu1 }
 0x26a   :  { %v4158_v37 = vpop.f32.mrf.mxu0 }
 0x26b   :  { %v4160_v62 = vpop.f32.mrf.mxu1 }
 0x26c   :  { %v4162_v46 = vpop.f32.mrf.mxu0 }
 0x26d   :  { %v4164_v0 = vpop.f32.mrf.mxu1 }
 0x26e   :  { %v4166_v13 = vpop.f32.mrf.mxu0 }
 0x26f   :  { %4352 = vst [vmem:[#allocation3_spill] sm:$0xff] %v4166_v13  ;;  %v4168_v16 = vpop.f32.mrf.mxu1  ;;  %v1522_v13 = vadd.f32 %v4181_v27, %v1453_v17 }
 0x270   :  { %v4170_v47 = vpop.f32.mrf.mxu0 }
 0x271   :  { %4353 = vst [vmem:[#allocation5_spill] sm:$0xff] %v4170_v47  ;;  %v3450_v39 = vpop.f32.mrf.mxu1  ;;  %v1748_v47 = vadd.f32 %v4126_v7, %v1521_v8  ;;  %v1525_v7 = vadd.f32 %v4132_v53, %v4181_v27 }
 0x272   :  { %v3476_v26 = vpop.f32.mrf.mxu0  ;;  %v1973_v56 = vadd.f32 %v3450_v39, %v1746_v29  ;;  %v1524_v39 = vadd.f32 %v4181_v27, %v4136_v9 }
 0x273   :  { %v1893_v49 = vpop.f32.mrf.mxu1  ;;  %v1752_v53 = vadd.f32 %v4134_v54, %v1525_v7  ;;  %v1528_v54 = vadd.f32 %v4181_v27, %v4152_v14 }
 0x274   :  { %v2120_v63 = vpop.f32.mrf.mxu0  ;;  %v1972_v31 = vadd.f32 %v1893_v49, %v1745_v24  ;;  %v2200_v33 = vadd.f32 %v3476_v26, %v1973_v56  ;;  %v1749_v49 = vadd.f32 %v4130_v35, %v1522_v13  ;;  %v1751_v35 = vadd.f32 %v4138_v12, %v1524_v39 }
 0x275   :  { %v3453_v15 = vpop.f32.mrf.mxu1  ;;  %v1527_v13 = vadd.f32 %v4140_v58, %v4181_v27 }
 0x276   :  { %v3479_v21 = vpop.f32.mrf.mxu0  ;;  %v2199_v25 = vadd.f32 %v2120_v63, %v1972_v31  ;;  %v1975_v19 = vadd.f32 %v3453_v15, %v1748_v47  ;;  %v1529_v31 = vadd.f32 %v4148_v59, %v4181_v27  ;;  %v1530_v59 = vadd.f32 %v4181_v27, %v4160_v62 }
 0x277   :  { %v1903_v2 = vpop.f32.mrf.mxu1  ;;  %v1754_v58 = vadd.f32 %v4142_v36, %v1527_v13  ;;  %v1755_v36 = vadd.f32 %v4154_v44, %v1528_v54 }
 0x278   :  { %v2130_v55 = vpop.f32.mrf.mxu0  ;;  %v1974_v6 = vadd.f32 %v1903_v2, %v1747_v57  ;;  %v2202_v47 = vadd.f32 %v3479_v21, %v1975_v19 }
 0x279   :  { %v3456_v4 = vpop.f32.mrf.mxu1 }
 0x27a   :  { %v3482_v20 = vpop.f32.mrf.mxu0  ;;  %v2201_v29 = vadd.f32 %v2130_v55, %v1974_v6 }
 0x27b   :  { %v1913_v18 = vpop.f32.mrf.mxu1 }
 0x27c   :  { %v2140_v50 = vpop.f32.mrf.mxu0  ;;  %v1976_v63 = vadd.f32 %v1913_v18, %v1749_v49 }
 0x27d   :  { %v3459_v41 = vpop.f32.mrf.mxu1 }
 0x27e   :  { %v4187_v3 = vpop.f32.mrf.mxu0 }
 0x27f   :  { %v1923_v28 = vpop.f32.mrf.mxu1 }
 0x280   :  { %v2150_v45 = vpop.f32.mrf.mxu0  ;;  %v1978_v21 = vadd.f32 %v1923_v28, %v1751_v35 }
 0x281   :  { %v4172_v61 = vpop.f32.mrf.mxu1 }
 0x282   :  { %v4202_v32 = vpop.f32.mrf.mxu0  ;;  %v2205_v57 = vadd.f32 %v2150_v45, %v1978_v21 }
 0x283   :  { %v4174_v43 = vpop.f32.mrf.mxu1 }
 0x285   :  { %v4176_v1 = vpop.f32.mrf.mxu1 }
 0x287   :  { %v4183_v30 = vpop.f32.mrf.mxu1 }
 0x289   :  { %v4189_v22 = vpop.f32.mrf.mxu1 }
 0x28a   :  { %4354 = vst [vmem:[#allocation4_spill] sm:$0xff] %v4189_v22  ;;  %v1523_v22 = vadd.f32 %v3404_v51, %v4181_v27  ;;  %v2160_v51 = vpop.f32.mrf.mxu0 }
 0x28b   :  { %v4191_v23 = vpop.f32.mrf.mxu1 }
 0x28c   :  { %4355 = vst [vmem:[#allocation7_spill] sm:$0xff] %v4191_v23  ;;  %v1750_v17 = vadd.f32 %v4128_v34, %v1523_v22  ;;  %v1526_v34 = vadd.f32 %v4181_v27, %v4144_v38  ;;  %v3491_v2 = vpop.f32.mrf.mxu0  ;;  %v2203_v22 = vadd.f32 %v2140_v50, %v1976_v63 }
 0x28d   :  { %v4195_v52 = vpop.f32.mrf.mxu1 }
 0x28e   :  { %v1977_v26 = vadd.f32 %v3456_v4, %v1750_v17  ;;  %v1753_v12 = vadd.f32 %v4146_v60, %v1526_v34  ;;  %v2170_v50 = vpop.f32.mrf.mxu0  ;;  %v1981_v60 = vadd.f32 %v4172_v61, %v1754_v58  ;;  %v1982_v61 = vadd.f32 %v4183_v30, %v1755_v36 }
 0x28f   :  { %v4197_v40 = vpop.f32.mrf.mxu1  ;;  %v1533_v30 = vadd.f32 %v4164_v0, %v4181_v27 }
 0x290   :  { %v2204_v4 = vadd.f32 %v3482_v20, %v1977_v26  ;;  %v3494_v45 = vpop.f32.mrf.mxu0  ;;  %v2208_v19 = vadd.f32 %v4202_v32, %v1981_v60  ;;  %v2209_v32 = vadd.f32 %v2170_v50, %v1982_v61 }
 0x291   :  { %v3502_v10 = vpop.f32.mrf.mxu1 }
 0x292   :  { %v2427_v24 = vadd.f32 %v3502_v10, %v2200_v33 }
 0x293   :  { %v2347_v23 = vpop.f32.mrf.mxu1 }
 0x294   :  { %v2426_v48 = vadd.f32 %v2347_v23, %v2199_v25  ;;  %v1979_v23 = vadd.f32 %v3459_v41, %v1752_v53  ;;  %v1980_v41 = vadd.f32 %v4174_v43, %v1753_v12  ;;  %v1756_v25 = vadd.f32 %v4150_v11, %v1529_v31 }
 0x295   :  { %v3505_v5 = vpop.f32.mrf.mxu1  ;;  %v1531_v43 = vadd.f32 %v4156_v42, %v4181_v27  ;;  %v1757_v11 = vadd.f32 %v4162_v46, %v1530_v59  ;;  %v1532_v42 = vadd.f32 %v4181_v27, %v4168_v16  ;;  %v4358_v16 = vld [vmem:[#allocation5_spill] sm:$0xff] }
 0x296   :  { %3526 = vmatprep.mubr.msk.f32.mxu0 %vm45_vm0, %v2426_v48  ;;  %v2429_v18 = vadd.f32 %v3505_v5, %v2202_v47  ;;  %v2206_v20 = vadd.f32 %v4187_v3, %v1979_v23  ;;  %v2207_v3 = vadd.f32 %v2160_v51, %v1980_v41  ;;  %v1983_v44 = vadd.f32 %v4176_v1, %v1756_v25  ;;  %v2180_v48 = vpop.f32.mrf.mxu0  ;;  %v4356_v51 = vld [vmem:[#allocation7_spill] sm:$0xff]  ;;  %v4357_v5 = vld [vmem:[#allocation4_spill] sm:$0xff] }
 0x297   :  { %v2357_v15 = vpop.f32.mrf.mxu1  ;;  %3527 = vmatmul.mubr.msk.f32.vlgmr.msra.gmra.mxu0 %vm45_vm0, %v2427_v24  ;;  %v1758_v39 = vadd.f32 %v4158_v37, %v1531_v43  ;;  %v1984_v1 = vadd.f32 %v4356_v51, %v1757_v11  ;;  %v1759_v63 = vadd.f32 %v4358_v16, %v1532_v42  ;;  %v4359_v47 = vld [vmem:[#allocation3_spill] sm:$0xff] }
 0x298   :  { %v2428_v9 = vadd.f32 %v2357_v15, %v2201_v29  ;;  %v2210_v24 = vadd.f32 %v3491_v2, %v1983_v44  ;;  %v1760_v26 = vadd.f32 %v4359_v47, %v1533_v30  ;;  %v3497_v0 = vpop.f32.mrf.mxu0 }
 0x299   :  { %v3508_v55 = vpop.f32.mrf.mxu1  ;;  %v1985_v46 = vadd.f32 %v4357_v5, %v1758_v39  ;;  %v2211_v35 = vadd.f32 %v2180_v48, %v1984_v1  ;;  %v1986_v34 = vadd.f32 %v4197_v40, %v1759_v63 }
 0x29a   :  { %3529 = vmatprep.mubr.msk.f32.mxu0 %vm45_vm0, %v2428_v9  ;;  %v2431_v28 = vadd.f32 %v3508_v55, %v2204_v4  ;;  %v1987_v53 = vadd.f32 %v4195_v52, %v1760_v26 }
 0x29b   :  { %v2367_v8 = vpop.f32.mrf.mxu1  ;;  %3530 = vmatmul.mubr.msk.f32.gmra.mxu0 %vm45_vm0, %v2429_v18  ;;  %v2212_v9 = vadd.f32 %v3494_v45, %v1985_v46  ;;  %v2190_v18 = vpop.f32.mrf.mxu0 }
 0x29c   :  { %v2430_v38 = vadd.f32 %v2367_v8, %v2203_v22  ;;  %v2213_v21 = vadd.f32 %v2190_v18, %v1986_v34  ;;  %v2214_v4 = vadd.f32 %v3497_v0, %v1987_v53 }
 0x29d   :  { %v3511_v56 = vpop.f32.mrf.mxu1 }
 0x29e   :  { %3532 = vmatprep.mubr.msk.f32.mxu0 %vm45_vm0, %v2430_v38  ;;  %v2433_v6 = vadd.f32 %v3511_v56, %v2206_v20 }
 0x29f   :  { %v2377_v10 = vpop.f32.mrf.mxu1  ;;  %3533 = vmatmul.mubr.msk.f32.gmra.mxu0 %vm45_vm0, %v2431_v28 }
 0x2a0   :  { %v2432_v14 = vadd.f32 %v2377_v10, %v2205_v57  ;;  %v4265_v57 = vld [vmem:[%s4338_s7] ss:$0 sm:$0xff] }
 0x2a1   :  { %v3514_v33 = vpop.f32.mrf.mxu1 }
 0x2a2   :  { %3535 = vmatprep.mubr.msk.f32.mxu0 %vm45_vm0, %v2432_v14  ;;  %v2435_v17 = vadd.f32 %v3514_v33, %v2208_v19 }
 0x2a3   :  { %v2387_v49 = vpop.f32.mrf.mxu1  ;;  %3536 = vmatmul.mubr.msk.f32.gmra.mxu0 %vm45_vm0, %v2433_v6 }
 0x2a4   :  { %v2434_v62 = vadd.f32 %v2387_v49, %v2207_v3 }
 0x2a5   :  { %v3517_v7 = vpop.f32.mrf.mxu1 }
 0x2a6   :  { %3538 = vmatprep.mubr.msk.f32.mxu0 %vm45_vm0, %v2434_v62  ;;  %v2437_v27 = vadd.f32 %v3517_v7, %v2210_v24 }
 0x2a7   :  { %v2397_v29 = vpop.f32.mrf.mxu1  ;;  %3539 = vmatmul.mubr.msk.f32.gmra.mxu0 %vm45_vm0, %v2435_v17 }
 0x2a8   :  { %v2436_v37 = vadd.f32 %v2397_v29, %v2209_v32 }
 0x2a9   :  { %v3520_v15 = vpop.f32.mrf.mxu1 }
 0x2aa   :  { %3541 = vmatprep.mubr.msk.f32.mxu0 %vm45_vm0, %v2436_v37  ;;  %v2439_v55 = vadd.f32 %v3520_v15, %v2212_v9 }
 0x2ab   :  { %v2407_v13 = vpop.f32.mrf.mxu1  ;;  %3542 = vmatmul.mubr.msk.f32.gmra.mxu0 %vm45_vm0, %v2437_v27 }
 0x2ac   :  { %v2438_v2 = vadd.f32 %v2407_v13, %v2211_v35 }
 0x2ad   :  { %v3523_v22 = vpop.f32.mrf.mxu1 }
 0x2ae   :  { %3544 = vmatprep.mubr.msk.f32.mxu0 %vm45_vm0, %v2438_v2  ;;  %v2441_v8 = vadd.f32 %v3523_v22, %v2214_v4 }
 0x2af   :  { %v2417_v23 = vpop.f32.mrf.mxu1  ;;  %3545 = vmatmul.mubr.msk.f32.gmra.mxu0 %vm45_vm0, %v2439_v55 }
 0x2b0   :  { %v2440_v40 = vadd.f32 %v2417_v23, %v2213_v21 }
 0x2b1   :  { %v3554_v52 = vpop.f32.mrf.mxu1 }
 0x2b2   :  { %3547 = vmatprep.mubr.msk.f32.mxu0 %vm45_vm0, %v2440_v40 }
 0x2b3   :  { %3548 = vmatmul.mubr.msk.f32.gmra.mxu0 %vm45_vm0, %v2441_v8  ;;  %v2735_v12 = vpop.f32.mrf.mxu1 }
 0x2b5   :  { %v3557_v54 = vpop.f32.mrf.mxu1 }
 0x2b7   :  { %v2745_v38 = vpop.f32.mrf.mxu1 }
 0x2b9   :  { %v3560_v58 = vpop.f32.mrf.mxu1 }
 0x2bb   :  { %v2755_v31 = vpop.f32.mrf.mxu1 }
 0x2bd   :  { %v3563_v50 = vpop.f32.mrf.mxu1 }
 0x2bf   :  { %v2765_v28 = vpop.f32.mrf.mxu1 }
 0x2c1   :  { %v3566_v60 = vpop.f32.mrf.mxu1 }
 0x2c3   :  { %v2775_v45 = vpop.f32.mrf.mxu1 }
 0x2c5   :  { %v3569_v49 = vpop.f32.mrf.mxu1 }
 0x2c7   :  { %v2785_v17 = vpop.f32.mrf.mxu1 }
 0x2c9   :  { %v3572_v46 = vpop.f32.mrf.mxu1 }
 0x2cb   :  { %v2795_v0 = vpop.f32.mrf.mxu1 }
 0x2cd   :  { %v3575_v13 = vpop.f32.mrf.mxu1 }
 0x2cf   :  { %v2805_v4 = vpop.f32.mrf.mxu1 }
 0x357   :  { %v3528_v56 = vpop.f32.mrf.mxu0 }
 0x358   :  { %v2741_v41 = vadd.f32 %v3554_v52, %v3528_v56 }
 0x359   :  { %v2558_v20 = vpop.f32.mrf.mxu0 }
 0x35a   :  { %v2822_v10 = vadd.f32 %v4265_v57, %v2741_v41  ;;  %v2736_v36 = vadd.f32 %v2735_v12, %v2558_v20 }
 0x35b   :  { %v3531_v59 = vpop.f32.mrf.mxu0 }
 0x35c   :  { %2838 = vst [vmem:[%s4339_s8 + $0x8] sm:$0xff] %v2822_v10  ;;  %v2821_v14 = vadd.f32 %v4265_v57, %v2736_v36  ;;  %v2751_v25 = vadd.f32 %v3557_v54, %v3531_v59 }
 0x35d   :  { %v2568_v43 = vpop.f32.mrf.mxu0 }
 0x35e   :  { %2837 = vst [vmem:[%s4339_s8] sm:$0xff] %v2821_v14  ;;  %v2824_v6 = vadd.f32 %v4265_v57, %v2751_v25  ;;  %v2746_v33 = vadd.f32 %v2745_v38, %v2568_v43 }
 0x35f   :  { %v3534_v3 = vpop.f32.mrf.mxu0 }
 0x360   :  { %2840 = vst [vmem:[%s4339_s8 + $0x18] sm:$0xff] %v2824_v6  ;;  %v2823_v61 = vadd.f32 %v4265_v57, %v2746_v33  ;;  %v2761_v19 = vadd.f32 %v3560_v58, %v3534_v3 }
 0x361   :  { %v2578_v44 = vpop.f32.mrf.mxu0 }
 0x362   :  { %2839 = vst [vmem:[%s4339_s8 + $0x10] sm:$0xff] %v2823_v61  ;;  %v2826_v11 = vadd.f32 %v4265_v57, %v2761_v19  ;;  %v2756_v42 = vadd.f32 %v2755_v31, %v2578_v44 }
 0x363   :  { %v3537_v62 = vpop.f32.mrf.mxu0 }
 0x364   :  { %2842 = vst [vmem:[%s4339_s8 + $0x28] sm:$0xff] %v2826_v11  ;;  %v2825_v39 = vadd.f32 %v4265_v57, %v2756_v42  ;;  %v2771_v30 = vadd.f32 %v3563_v50, %v3537_v62 }
 0x365   :  { %v2588_v48 = vpop.f32.mrf.mxu0 }
 0x366   :  { %2841 = vst [vmem:[%s4339_s8 + $0x20] sm:$0xff] %v2825_v39  ;;  %v2828_v7 = vadd.f32 %v4265_v57, %v2771_v30  ;;  %v2766_v32 = vadd.f32 %v2765_v28, %v2588_v48 }
 0x367   :  { %v3540_v51 = vpop.f32.mrf.mxu0 }
 0x368   :  { %2844 = vst [vmem:[%s4339_s8 + $0x38] sm:$0xff] %v2828_v7  ;;  %v2827_v1 = vadd.f32 %v4265_v57, %v2766_v32  ;;  %v2781_v24 = vadd.f32 %v3566_v60, %v3540_v51 }
 0x369   :  { %v2598_v5 = vpop.f32.mrf.mxu0 }
 0x36a   :  { %2843 = vst [vmem:[%s4339_s8 + $0x30] sm:$0xff] %v2827_v1  ;;  %v2830_v29 = vadd.f32 %v4265_v57, %v2781_v24  ;;  %v2776_v16 = vadd.f32 %v2775_v45, %v2598_v5 }
 0x36b   :  { %v3543_v63 = vpop.f32.mrf.mxu0 }
 0x36c   :  { %2846 = vst [vmem:[%s4339_s8 + $0x48] sm:$0xff] %v2830_v29  ;;  %v2829_v37 = vadd.f32 %v4265_v57, %v2776_v16  ;;  %v2791_v47 = vadd.f32 %v3569_v49, %v3543_v63 }
 0x36d   :  { %v2608_v26 = vpop.f32.mrf.mxu0 }
 0x36e   :  { %2845 = vst [vmem:[%s4339_s8 + $0x40] sm:$0xff] %v2829_v37  ;;  %v2832_v27 = vadd.f32 %v4265_v57, %v2791_v47  ;;  %v2786_v15 = vadd.f32 %v2785_v17, %v2608_v26 }
 0x36f   :  { %v3546_v35 = vpop.f32.mrf.mxu0 }
 0x370   :  { %2848 = vst [vmem:[%s4339_s8 + $0x58] sm:$0xff] %v2832_v27  ;;  %v2831_v34 = vadd.f32 %v4265_v57, %v2786_v15  ;;  %v2801_v9 = vadd.f32 %v3572_v46, %v3546_v35 }
 0x371   :  { %v2618_v53 = vpop.f32.mrf.mxu0 }
 0x372   :  { %2847 = vst [vmem:[%s4339_s8 + $0x50] sm:$0xff] %v2831_v34  ;;  %v2834_v2 = vadd.f32 %v4265_v57, %v2801_v9  ;;  %v2796_v18 = vadd.f32 %v2795_v0, %v2618_v53 }
 0x373   :  { %v3549_v55 = vpop.f32.mrf.mxu0 }
 0x374   :  { %2850 = vst [vmem:[%s4339_s8 + $0x68] sm:$0xff] %v2834_v2  ;;  %v2833_v22 = vadd.f32 %v4265_v57, %v2796_v18  ;;  %v2811_v21 = vadd.f32 %v3575_v13, %v3549_v55 }
 0x375   :  { %v2628_v23 = vpop.f32.mrf.mxu0 }
 0x376   :  { %2849 = vst [vmem:[%s4339_s8 + $0x60] sm:$0xff] %v2833_v22  ;;  %v2836_v40 = vadd.f32 %v4265_v57, %v2811_v21  ;;  %v2806_v8 = vadd.f32 %v2805_v4, %v2628_v23 }
 0x378   :  { %2852 = vst [vmem:[%s4339_s8 + $0x78] sm:$0xff] %v2836_v40  ;;  %v2835_v52 = vadd.f32 %v4265_v57, %v2806_v8 }
 0x37a   :  { %2851 = vst [vmem:[%s4339_s8 + $0x70] sm:$0xff] %v2835_v52 }

</bundles_post_ra>
